<compile_context>
chip_gen: v7x
topology: tpu7x:2x2x1
jax: 0.10.0
libtpu: 0.0.40
codegen_flags: <defaults>
</compile_context>

<pallas_src>
import functools
import math

import jax
import jax.numpy as jnp
from jax.experimental import pallas as pl
from jax.experimental.pallas import tpu as pltpu


# ----------------------------------------------------------------------------
# in-kernel helpers
# ----------------------------------------------------------------------------
def _layer_norm(x, g, b, eps=1e-5):
    # PyTorch nn.LayerNorm over the last dim (biased variance, eps inside sqrt).
    mu = jnp.mean(x, axis=-1, keepdims=True)
    var = jnp.mean((x - mu) ** 2, axis=-1, keepdims=True)
    return (x - mu) * jax.lax.rsqrt(var + eps) * g + b


def _gelu_tanh(x):
    # tanh-form GELU: one EUP tanh per element instead of a VPU erf polynomial.
    # |error| vs exact-erf GELU < ~3e-3, far inside the 1e-2 self-check.
    c = math.sqrt(2.0 / math.pi)
    return 0.5 * x * (1.0 + jnp.tanh(c * (x + 0.044715 * x * x * x)))


# ----------------------------------------------------------------------------
# fused encoder-block kernel
# ----------------------------------------------------------------------------
def encoder_block_kernel(
    x_ref, ln1g_ref, ln1b_ref, wqkv_ref, bqkv_ref, wo_ref, bo_ref,
    ln2g_ref, ln2b_ref, w1_ref, b1_ref, w2_ref, b2_ref, out_ref,
    *, num_heads, head_dim, seq_len,
):
    bb, s_pad, _ = x_ref.shape
    E = num_heads * head_dim
    R = bb * s_pad

    # flatten (batch_block, S_pad) -> rows; tile-preserving since s_pad % 8 == 0
    x = x_ref[...].reshape(R, E)

    # ---------------- MultiheadSelfAttentionBlock (pre-LN) ----------------
    y = _layer_norm(x, ln1g_ref[...], ln1b_ref[...])
    # bf16 operands, f32 accumulation.  1/sqrt(head_dim) is already folded
    # into the Q columns of wqkv / bqkv (see prepare_params).
    qkv = jnp.dot(y.astype(jnp.bfloat16), wqkv_ref[...],
                  preferred_element_type=jnp.float32) + bqkv_ref[...]

    # Head split on the bf16 copy (half the relayout traffic of f32).
    qkv_bf = qkv.astype(jnp.bfloat16).reshape(bb, s_pad, 3 * E)

    def heads(base):  # -> [num_heads*bb, s_pad, head_dim]
        return jnp.concatenate(
            [qkv_bf[:, :, base + h * head_dim: base + (h + 1) * head_dim]
             for h in range(num_heads)], axis=0)

    qh, kh, vh = heads(0), heads(E), heads(2 * E)

    # One batched dot_general across all (head, batch) pairs.  'bqd,bkd->bqk'
    # is the native flash-attention layout: no K transpose is materialized.
    s = jnp.einsum('bqd,bkd->bqk', qh, kh, preferred_element_type=jnp.float32)
    if s_pad > seq_len:                                     # static: mask padded keys
        key_pos = jax.lax.broadcasted_iota(jnp.int32, (1, 1, s_pad), 2)
        s = jnp.where(key_pos < seq_len, s, jnp.float32(-1e30))
    s = s - jnp.max(s, axis=-1, keepdims=True)
    p = jnp.exp(s)
    p = p * pl.reciprocal(jnp.sum(p, axis=-1, keepdims=True), approx=True)
    ctx = jnp.einsum('bqk,bkd->bqd', p.astype(jnp.bfloat16), vh,
                     preferred_element_type=jnp.float32)

    # lane-concat heads back to [R, E] (bf16), then ONE K=E output projection
    ctx_bf = ctx.astype(jnp.bfloat16)
    ctx_cat = jnp.concatenate(
        [ctx_bf[h * bb:(h + 1) * bb] for h in range(num_heads)], axis=-1
    ).reshape(R, E)
    attn = jnp.dot(ctx_cat, wo_ref[...],
                   preferred_element_type=jnp.float32) + bo_ref[...]
    x = x + attn                                            # residual 1

    # ---------------- MLPBlock (pre-LN) ----------------
    z = _layer_norm(x, ln2g_ref[...], ln2b_ref[...])
    h1 = jnp.dot(z.astype(jnp.bfloat16), w1_ref[...],
                 preferred_element_type=jnp.float32) + b1_ref[...]
    h1 = _gelu_tanh(h1)
    h2 = jnp.dot(h1.astype(jnp.bfloat16), w2_ref[...],
                 preferred_element_type=jnp.float32) + b2_ref[...]
    out_ref[...] = (x + h2).reshape(bb, s_pad, E).astype(out_ref.dtype)   # residual 2


# ----------------------------------------------------------------------------
# wrapper
# ----------------------------------------------------------------------------
def transformer_encoder_block(x, params, *, num_heads, batch_block=None):
    """x: [B, S, E] float32 -> [B, S, E].

    `params` must come from `prepare_params` (bf16 weights, q-scale folded in).
    """
    B, S, E = x.shape
    assert E % num_heads == 0
    head_dim = E // num_heads
    M = params["w1"].shape[1]

    s_pad = ((S + 7) // 8) * 8                  # sublane-align the sequence
    if s_pad != S:
        x = jnp.pad(x, ((0, 0), (0, s_pad - S), (0, 0)))

    if batch_block is None:
        # target ~2048 rows per step (amortizes the ~0.35us per-step overhead,
        # taller-M matmuls on v5e/v6e's 128 MiB VMEM), but cap at B//2 so the
        # grid has >= 2 steps and both v7x TensorCores get work.
        max_bb = max(1, 2048 // s_pad)
        if B >= 2:
            max_bb = min(max_bb, B // 2)
        batch_block = max(d for d in range(1, B + 1) if B % d == 0 and d <= max_bb)

    kernel = functools.partial(
        encoder_block_kernel, num_heads=num_heads, head_dim=head_dim, seq_len=S)

    def wspec(shape):
        return pl.BlockSpec(shape, lambda i: (0, 0))

    # --- VMEM footprint estimate (drives vmem_limit_bytes) ---
    rows = batch_block * s_pad
    weight_bytes = sum(int(v.size) * v.dtype.itemsize for v in params.values())
    act_bytes = (rows * 3 * E * 6            # qkv slab (f32 + bf16 copy)
                 + rows * M * 6              # h1 slab (f32 + bf16 copy)
                 + rows * E * 32             # y/z/ctx/attn/h2/residuals
                 + num_heads * batch_block * s_pad * s_pad * 8)   # scores + probs
    io_bytes = 2 * 2 * rows * E * 4          # x / out blocks, double-buffered
    vmem_est = io_bytes + 2 * weight_bytes + act_bytes
    vmem_limit = int(min(100 * 2 ** 20, max(32 * 2 ** 20, 2 * vmem_est)))

    # --- cost estimate for the XLA scheduler ---
    r_total = B * s_pad
    flops = 2 * r_total * E * (4 * E + 2 * M) \
        + 4 * B * num_heads * s_pad * s_pad * head_dim
    transcendentals = r_total * M + B * num_heads * s_pad * s_pad
    bytes_accessed = int(x.size) * 4 + B * s_pad * E * 4 + weight_bytes

    out = pl.pallas_call(
        kernel,
        out_shape=jax.ShapeDtypeStruct((B, s_pad, E), x.dtype),
        grid=(B // batch_block,),
        in_specs=[
            pl.BlockSpec((batch_block, s_pad, E), lambda i: (i, 0, 0)),
            wspec((1, E)), wspec((1, E)),               # ln1 gamma/beta
            wspec((E, 3 * E)), wspec((1, 3 * E)),       # in_proj weight.T (bf16), bias
            wspec((E, E)), wspec((1, E)),               # out_proj weight.T (bf16), bias
            wspec((1, E)), wspec((1, E)),               # ln2 gamma/beta
            wspec((E, M)), wspec((1, M)),               # mlp fc1 weight.T (bf16), bias
            wspec((M, E)), wspec((1, E)),               # mlp fc2 weight.T (bf16), bias
        ],
        out_specs=pl.BlockSpec((batch_block, s_pad, E), lambda i: (i, 0, 0)),
        compiler_params=pltpu.CompilerParams(
            dimension_semantics=("parallel",),
            vmem_limit_bytes=vmem_limit),
        cost_estimate=pl.CostEstimate(
            flops=int(flops), transcendentals=int(transcendentals),
            bytes_accessed=int(bytes_accessed)),
    )(x, params["ln1_g"], params["ln1_b"], params["wqkv"], params["bqkv"],
      params["wo"], params["bo"], params["ln2_g"], params["ln2_b"],
      params["w1"], params["b1"], params["w2"], params["b2"])

    return out[:, :S, :] if s_pad != S else out


# ----------------------------------------------------------------------------
# params: PyTorch-layout init, one-time kernel-side preparation, JAX reference
# ----------------------------------------------------------------------------
def init_encoder_params(key, *, embedding_dim, mlp_size):
    E, M = embedding_dim, mlp_size
    k1, k2, k3, k4, k5, k6, k7, k8 = jax.random.split(key, 8)
    std = 0.02
    return {
        "ln1_g": jnp.ones((1, E), jnp.float32),
        "ln1_b": jnp.zeros((1, E), jnp.float32),
        "wqkv": std * jax.random.normal(k1, (E, 3 * E), jnp.float32),  # in_proj_weight.T
        "bqkv": std * jax.random.normal(k5, (1, 3 * E), jnp.float32),
        "wo": std * jax.random.normal(k2, (E, E), jnp.float32),        # out_proj.weight.T
        "bo": std * jax.random.normal(k6, (1, E), jnp.float32),
        "ln2_g": jnp.ones((1, E), jnp.float32),
        "ln2_b": jnp.zeros((1, E), jnp.float32),
        "w1": std * jax.random.normal(k3, (E, M), jnp.float32),        # fc1.weight.T
        "b1": std * jax.random.normal(k7, (1, M), jnp.float32),
        "w2": std * jax.random.normal(k4, (M, E), jnp.float32),        # fc2.weight.T
        "b2": std * jax.random.normal(k8, (1, E), jnp.float32),
    }


def prepare_params(params, *, num_heads):
    """One-time transform: fold 1/sqrt(head_dim) into the Q projection and
    cast the matmul weights to bf16 (biases / LN params stay f32)."""
    E = params["wo"].shape[0]
    scale = 1.0 / math.sqrt(E // num_heads)
    out = dict(params)
    out["wqkv"] = params["wqkv"].at[:, :E].multiply(scale).astype(jnp.bfloat16)
    out["bqkv"] = params["bqkv"].at[:, :E].multiply(scale)
    out["wo"] = params["wo"].astype(jnp.bfloat16)
    out["w1"] = params["w1"].astype(jnp.bfloat16)
    out["w2"] = params["w2"].astype(jnp.bfloat16)
    return out


def reference_forward(x, p, *, num_heads):
    """Pure-JAX, f32, exact-erf reference of TransformerEncoderBlock (eval)."""
    B, S, E = x.shape
    D = E // num_heads

    def ln(t, g, b):
        mu = t.mean(-1, keepdims=True)
        var = ((t - mu) ** 2).mean(-1, keepdims=True)
        return (t - mu) / jnp.sqrt(var + 1e-5) * g + b

    y = ln(x, p["ln1_g"], p["ln1_b"])
    qkv = y @ p["wqkv"] + p["bqkv"]
    q, k, v = qkv[..., :E], qkv[..., E:2 * E], qkv[..., 2 * E:]
    q = q * (1.0 / math.sqrt(D))
    q = q.reshape(B, S, num_heads, D).transpose(0, 2, 1, 3)
    k = k.reshape(B, S, num_heads, D).transpose(0, 2, 1, 3)
    v = v.reshape(B, S, num_heads, D).transpose(0, 2, 1, 3)
    s = jnp.einsum("bhqd,bhkd->bhqk", q, k)
    a = jax.nn.softmax(s, axis=-1)
    ctx = jnp.einsum("bhqk,bhkd->bhqd", a, v)
    ctx = ctx.transpose(0, 2, 1, 3).reshape(B, S, E)
    x = x + (ctx @ p["wo"] + p["bo"])
    z = ln(x, p["ln2_g"], p["ln2_b"])
    h = jax.nn.gelu(z @ p["w1"] + p["b1"], approximate=False)
    return x + (h @ p["w2"] + p["b2"])


if __name__ == "__main__":
    # small shapes consistent with TransformerEncoderBlock (E divisible by heads)
    B, S, E, H, M = 2, 13, 128, 4, 256

    key = jax.random.PRNGKey(0)
    k_x, k_p = jax.random.split(key)
    x = jax.random.normal(k_x, (B, S, E), jnp.float32)
    params = init_encoder_params(k_p, embedding_dim=E, mlp_size=M)
    prepared = prepare_params(params, num_heads=H)          # one-time weight prep

    out = transformer_encoder_block(x, prepared, num_heads=H)
    jax.block_until_ready(out)

    assert out.shape == (B, S, E), out.shape
    assert bool(jnp.all(jnp.isfinite(out)))

    ref = reference_forward(x, params, num_heads=H)
    assert bool(jnp.allclose(out, ref, atol=1e-2, rtol=1e-2)), \
        float(jnp.max(jnp.abs(out - ref)))

    print("KERNEL_OK")
</pallas_src>

<mosaic_0001>
module attributes {stable_mosaic.version = 11 : i64} {
  func.func @encoder_block_kernel(%arg0: i32, %arg1: memref<1x16x128xf32, #tpu.memory_space<vmem>>, %arg2: memref<1x128xf32, #tpu.memory_space<vmem>>, %arg3: memref<1x128xf32, #tpu.memory_space<vmem>>, %arg4: memref<128x384xbf16, #tpu.memory_space<vmem>>, %arg5: memref<1x384xf32, #tpu.memory_space<vmem>>, %arg6: memref<128x128xbf16, #tpu.memory_space<vmem>>, %arg7: memref<1x128xf32, #tpu.memory_space<vmem>>, %arg8: memref<1x128xf32, #tpu.memory_space<vmem>>, %arg9: memref<1x128xf32, #tpu.memory_space<vmem>>, %arg10: memref<128x256xbf16, #tpu.memory_space<vmem>>, %arg11: memref<1x256xf32, #tpu.memory_space<vmem>>, %arg12: memref<256x128xbf16, #tpu.memory_space<vmem>>, %arg13: memref<1x128xf32, #tpu.memory_space<vmem>>, %arg14: memref<1x16x128xf32, #tpu.memory_space<vmem>>) attributes {dimension_semantics = [#tpu.dimension_semantics<parallel>], iteration_bounds = array<i64: 2>, scalar_prefetch = 0 : i64, scratch_operands = 0 : i64, tpu.core_type = #tpu.core_type<tc>, window_params = [{transform_indices = @transform_0, window_bounds = array<i64: 1, 16, 128>}, {pipeline_mode = #tpu.pipeline_mode<synchronous>, transform_indices = @transform_1, window_bounds = array<i64: 1, 128>}, {pipeline_mode = #tpu.pipeline_mode<synchronous>, transform_indices = @transform_2, window_bounds = array<i64: 1, 128>}, {pipeline_mode = #tpu.pipeline_mode<synchronous>, transform_indices = @transform_3, window_bounds = array<i64: 128, 384>}, {pipeline_mode = #tpu.pipeline_mode<synchronous>, transform_indices = @transform_4, window_bounds = array<i64: 1, 384>}, {pipeline_mode = #tpu.pipeline_mode<synchronous>, transform_indices = @transform_5, window_bounds = array<i64: 128, 128>}, {pipeline_mode = #tpu.pipeline_mode<synchronous>, transform_indices = @transform_6, window_bounds = array<i64: 1, 128>}, {pipeline_mode = #tpu.pipeline_mode<synchronous>, transform_indices = @transform_7, window_bounds = array<i64: 1, 128>}, {pipeline_mode = #tpu.pipeline_mode<synchronous>, transform_indices = @transform_8, window_bounds = array<i64: 1, 128>}, {pipeline_mode = #tpu.pipeline_mode<synchronous>, transform_indices = @transform_9, window_bounds = array<i64: 128, 256>}, {pipeline_mode = #tpu.pipeline_mode<synchronous>, transform_indices = @transform_10, window_bounds = array<i64: 1, 256>}, {pipeline_mode = #tpu.pipeline_mode<synchronous>, transform_indices = @transform_11, window_bounds = array<i64: 256, 128>}, {pipeline_mode = #tpu.pipeline_mode<synchronous>, transform_indices = @transform_12, window_bounds = array<i64: 1, 128>}, {transform_indices = @transform_13, window_bounds = array<i64: 1, 16, 128>}]} {
    %c0 = arith.constant 0 : index
    %c0_0 = arith.constant 0 : index
    %c0_1 = arith.constant 0 : index
    %0 = vector.load %arg1[%c0, %c0_0, %c0_1] : memref<1x16x128xf32, #tpu.memory_space<vmem>>, vector<1x16x128xf32>
    %1 = vector.shape_cast %0 : vector<1x16x128xf32> to vector<16x128xf32>
    %c0_2 = arith.constant 0 : index
    %c0_3 = arith.constant 0 : index
    %2 = vector.load %arg2[%c0_2, %c0_3] : memref<1x128xf32, #tpu.memory_space<vmem>>, vector<1x128xf32>
    %c0_4 = arith.constant 0 : index
    %c0_5 = arith.constant 0 : index
    %3 = vector.load %arg3[%c0_4, %c0_5] : memref<1x128xf32, #tpu.memory_space<vmem>>, vector<1x128xf32>
    %cst = arith.constant dense<0.000000e+00> : vector<16xf32>
    %4 = vector.multi_reduction <add>, %1, %cst [1] : vector<16x128xf32> to vector<16xf32>
    %5 = vector.shape_cast %4 : vector<16xf32> to vector<16x1xf32>
    %cst_6 = arith.constant 1.280000e+02 : f32
    %6 = vector.broadcast %cst_6 : f32 to vector<16x1xf32>
    %7 = arith.divf %5, %6 : vector<16x1xf32>
    %8 = vector.broadcast %7 : vector<16x1xf32> to vector<16x128xf32>
    %9 = arith.subf %1, %8 : vector<16x128xf32>
    %10 = arith.mulf %9, %9 : vector<16x128xf32>
    %cst_7 = arith.constant dense<0.000000e+00> : vector<16xf32>
    %11 = vector.multi_reduction <add>, %10, %cst_7 [1] : vector<16x128xf32> to vector<16xf32>
    %12 = vector.shape_cast %11 : vector<16xf32> to vector<16x1xf32>
    %cst_8 = arith.constant 1.280000e+02 : f32
    %13 = vector.broadcast %cst_8 : f32 to vector<16x1xf32>
    %14 = arith.divf %12, %13 : vector<16x1xf32>
    %15 = vector.broadcast %7 : vector<16x1xf32> to vector<16x128xf32>
    %16 = arith.subf %1, %15 : vector<16x128xf32>
    %cst_9 = arith.constant 9.99999974E-6 : f32
    %17 = vector.broadcast %cst_9 : f32 to vector<16x1xf32>
    %18 = arith.addf %14, %17 : vector<16x1xf32>
    %19 = math.rsqrt %18 : vector<16x1xf32>
    %20 = vector.broadcast %19 : vector<16x1xf32> to vector<16x128xf32>
    %21 = arith.mulf %16, %20 : vector<16x128xf32>
    %22 = vector.broadcast %2 : vector<1x128xf32> to vector<16x128xf32>
    %23 = arith.mulf %21, %22 : vector<16x128xf32>
    %24 = vector.broadcast %3 : vector<1x128xf32> to vector<16x128xf32>
    %25 = arith.addf %23, %24 : vector<16x128xf32>
    %26 = arith.truncf %25 : vector<16x128xf32> to vector<16x128xbf16>
    %c0_10 = arith.constant 0 : index
    %c0_11 = arith.constant 0 : index
    %27 = vector.load %arg4[%c0_10, %c0_11] : memref<128x384xbf16, #tpu.memory_space<vmem>>, vector<128x384xbf16>
    %cst_12 = arith.constant dense<0.000000e+00> : vector<16x384xf32>
    %28 = tpu.matmul %26, %27, %cst_12 {dimension_numbers = #tpu.dot_dimension_numbers<[1], [0], [0], [1], [0, 0, 1, 1], [], []>} : vector<16x128xbf16>, vector<128x384xbf16>, vector<16x384xf32> -> vector<16x384xf32>
    %c0_13 = arith.constant 0 : index
    %c0_14 = arith.constant 0 : index
    %29 = vector.load %arg5[%c0_13, %c0_14] : memref<1x384xf32, #tpu.memory_space<vmem>>, vector<1x384xf32>
    %30 = vector.broadcast %29 : vector<1x384xf32> to vector<16x384xf32>
    %31 = arith.addf %28, %30 : vector<16x384xf32>
    %32 = arith.truncf %31 : vector<16x384xf32> to vector<16x384xbf16>
    %33 = vector.shape_cast %32 : vector<16x384xbf16> to vector<1x16x384xbf16>
    %34 = vector.extract_strided_slice %33 {offsets = [0, 0, 0], sizes = [1, 16, 32], strides = [1, 1, 1]} : vector<1x16x384xbf16> to vector<1x16x32xbf16>
    %35 = vector.extract_strided_slice %33 {offsets = [0, 0, 32], sizes = [1, 16, 32], strides = [1, 1, 1]} : vector<1x16x384xbf16> to vector<1x16x32xbf16>
    %36 = vector.extract_strided_slice %33 {offsets = [0, 0, 64], sizes = [1, 16, 32], strides = [1, 1, 1]} : vector<1x16x384xbf16> to vector<1x16x32xbf16>
    %37 = vector.extract_strided_slice %33 {offsets = [0, 0, 96], sizes = [1, 16, 32], strides = [1, 1, 1]} : vector<1x16x384xbf16> to vector<1x16x32xbf16>
    %38 = tpu.concatenate %34, %35, %36, %37 in 0 : vector<1x16x32xbf16>, vector<1x16x32xbf16>, vector<1x16x32xbf16>, vector<1x16x32xbf16> -> vector<4x16x32xbf16>
    %39 = vector.extract_strided_slice %33 {offsets = [0, 0, 128], sizes = [1, 16, 32], strides = [1, 1, 1]} : vector<1x16x384xbf16> to vector<1x16x32xbf16>
    %40 = vector.extract_strided_slice %33 {offsets = [0, 0, 160], sizes = [1, 16, 32], strides = [1, 1, 1]} : vector<1x16x384xbf16> to vector<1x16x32xbf16>
    %41 = vector.extract_strided_slice %33 {offsets = [0, 0, 192], sizes = [1, 16, 32], strides = [1, 1, 1]} : vector<1x16x384xbf16> to vector<1x16x32xbf16>
    %42 = vector.extract_strided_slice %33 {offsets = [0, 0, 224], sizes = [1, 16, 32], strides = [1, 1, 1]} : vector<1x16x384xbf16> to vector<1x16x32xbf16>
    %43 = tpu.concatenate %39, %40, %41, %42 in 0 : vector<1x16x32xbf16>, vector<1x16x32xbf16>, vector<1x16x32xbf16>, vector<1x16x32xbf16> -> vector<4x16x32xbf16>
    %44 = vector.extract_strided_slice %33 {offsets = [0, 0, 256], sizes = [1, 16, 32], strides = [1, 1, 1]} : vector<1x16x384xbf16> to vector<1x16x32xbf16>
    %45 = vector.extract_strided_slice %33 {offsets = [0, 0, 288], sizes = [1, 16, 32], strides = [1, 1, 1]} : vector<1x16x384xbf16> to vector<1x16x32xbf16>
    %46 = vector.extract_strided_slice %33 {offsets = [0, 0, 320], sizes = [1, 16, 32], strides = [1, 1, 1]} : vector<1x16x384xbf16> to vector<1x16x32xbf16>
    %47 = vector.extract_strided_slice %33 {offsets = [0, 0, 352], sizes = [1, 16, 32], strides = [1, 1, 1]} : vector<1x16x384xbf16> to vector<1x16x32xbf16>
    %48 = tpu.concatenate %44, %45, %46, %47 in 0 : vector<1x16x32xbf16>, vector<1x16x32xbf16>, vector<1x16x32xbf16>, vector<1x16x32xbf16> -> vector<4x16x32xbf16>
    "tpu.trace_start"() <{level = 10 : i32, message = "bqd,bkd->bqk"}> : () -> ()
    %cst_15 = arith.constant dense<0.000000e+00> : vector<4x16x16xf32>
    %49 = tpu.matmul %38, %43, %cst_15 {dimension_numbers = #tpu.dot_dimension_numbers<[2], [2], [1], [1], [0, 0, 0, 1, 1, 1], [0], [0]>} : vector<4x16x32xbf16>, vector<4x16x32xbf16>, vector<4x16x16xf32> -> vector<4x16x16xf32>
    "tpu.trace_stop"() : () -> ()
    %50 = tpu.iota {dimensions = array<i32: 2>} : vector<1x1x16xi32>
    %c13_i32 = arith.constant 13 : i32
    %51 = vector.broadcast %c13_i32 : i32 to vector<1x1x16xi32>
    %52 = arith.cmpi slt, %50, %51 : vector<1x1x16xi32>
    %cst_16 = arith.constant -1.000000e+30 : f32
    %53 = vector.shape_cast %52 : vector<1x1x16xi1> to vector<1x1x16xi1>
    %54 = vector.broadcast %53 : vector<1x1x16xi1> to vector<4x16x16xi1>
    %55 = vector.broadcast %cst_16 : f32 to vector<4x16x16xf32>
    %56 = arith.select %54, %49, %55 : vector<4x16x16xi1>, vector<4x16x16xf32>
    %cst_17 = arith.constant dense<0xFF800000> : vector<4x16xf32>
    %57 = vector.multi_reduction <maximumf>, %56, %cst_17 [2] : vector<4x16x16xf32> to vector<4x16xf32>
    %58 = vector.shape_cast %57 : vector<4x16xf32> to vector<4x16x1xf32>
    %59 = vector.broadcast %58 : vector<4x16x1xf32> to vector<4x16x16xf32>
    %60 = arith.subf %56, %59 : vector<4x16x16xf32>
    %61 = math.exp %60 : vector<4x16x16xf32>
    %cst_18 = arith.constant dense<0.000000e+00> : vector<4x16xf32>
    %62 = vector.multi_reduction <add>, %61, %cst_18 [2] : vector<4x16x16xf32> to vector<4x16xf32>
    %63 = vector.shape_cast %62 : vector<4x16xf32> to vector<4x16x1xf32>
    %64 = tpu.reciprocal %63 {approx = true} : vector<4x16x1xf32> -> vector<4x16x1xf32>
    %65 = vector.broadcast %64 : vector<4x16x1xf32> to vector<4x16x16xf32>
    %66 = arith.mulf %61, %65 : vector<4x16x16xf32>
    %67 = arith.truncf %66 : vector<4x16x16xf32> to vector<4x16x16xbf16>
    "tpu.trace_start"() <{level = 10 : i32, message = "bqk,bkd->bqd"}> : () -> ()
    %cst_19 = arith.constant dense<0.000000e+00> : vector<4x16x32xf32>
    %68 = tpu.matmul %67, %48, %cst_19 {dimension_numbers = #tpu.dot_dimension_numbers<[2], [1], [1], [2], [0, 0, 0, 1, 1, 2], [0], [0]>} : vector<4x16x16xbf16>, vector<4x16x32xbf16>, vector<4x16x32xf32> -> vector<4x16x32xf32>
    "tpu.trace_stop"() : () -> ()
    %69 = arith.truncf %68 : vector<4x16x32xf32> to vector<4x16x32xbf16>
    %70 = vector.extract_strided_slice %69 {offsets = [0, 0, 0], sizes = [1, 16, 32], strides = [1, 1, 1]} : vector<4x16x32xbf16> to vector<1x16x32xbf16>
    %71 = vector.extract_strided_slice %69 {offsets = [1, 0, 0], sizes = [1, 16, 32], strides = [1, 1, 1]} : vector<4x16x32xbf16> to vector<1x16x32xbf16>
    %72 = vector.extract_strided_slice %69 {offsets = [2, 0, 0], sizes = [1, 16, 32], strides = [1, 1, 1]} : vector<4x16x32xbf16> to vector<1x16x32xbf16>
    %73 = vector.extract_strided_slice %69 {offsets = [3, 0, 0], sizes = [1, 16, 32], strides = [1, 1, 1]} : vector<4x16x32xbf16> to vector<1x16x32xbf16>
    %74 = tpu.concatenate %70, %71, %72, %73 in 2 : vector<1x16x32xbf16>, vector<1x16x32xbf16>, vector<1x16x32xbf16>, vector<1x16x32xbf16> -> vector<1x16x128xbf16>
    %75 = vector.shape_cast %74 : vector<1x16x128xbf16> to vector<16x128xbf16>
    %c0_20 = arith.constant 0 : index
    %c0_21 = arith.constant 0 : index
    %76 = vector.load %arg6[%c0_20, %c0_21] : memref<128x128xbf16, #tpu.memory_space<vmem>>, vector<128x128xbf16>
    %cst_22 = arith.constant dense<0.000000e+00> : vector<16x128xf32>
    %77 = tpu.matmul %75, %76, %cst_22 {dimension_numbers = #tpu.dot_dimension_numbers<[1], [0], [0], [1], [0, 0, 1, 1], [], []>} : vector<16x128xbf16>, vector<128x128xbf16>, vector<16x128xf32> -> vector<16x128xf32>
    %c0_23 = arith.constant 0 : index
    %c0_24 = arith.constant 0 : index
    %78 = vector.load %arg7[%c0_23, %c0_24] : memref<1x128xf32, #tpu.memory_space<vmem>>, vector<1x128xf32>
    %79 = vector.broadcast %78 : vector<1x128xf32> to vector<16x128xf32>
    %80 = arith.addf %77, %79 : vector<16x128xf32>
    %81 = arith.addf %1, %80 : vector<16x128xf32>
    %c0_25 = arith.constant 0 : index
    %c0_26 = arith.constant 0 : index
    %82 = vector.load %arg8[%c0_25, %c0_26] : memref<1x128xf32, #tpu.memory_space<vmem>>, vector<1x128xf32>
    %c0_27 = arith.constant 0 : index
    %c0_28 = arith.constant 0 : index
    %83 = vector.load %arg9[%c0_27, %c0_28] : memref<1x128xf32, #tpu.memory_space<vmem>>, vector<1x128xf32>
    %cst_29 = arith.constant dense<0.000000e+00> : vector<16xf32>
    %84 = vector.multi_reduction <add>, %81, %cst_29 [1] : vector<16x128xf32> to vector<16xf32>
    %85 = vector.shape_cast %84 : vector<16xf32> to vector<16x1xf32>
    %cst_30 = arith.constant 1.280000e+02 : f32
    %86 = vector.broadcast %cst_30 : f32 to vector<16x1xf32>
    %87 = arith.divf %85, %86 : vector<16x1xf32>
    %88 = vector.broadcast %87 : vector<16x1xf32> to vector<16x128xf32>
    %89 = arith.subf %81, %88 : vector<16x128xf32>
    %90 = arith.mulf %89, %89 : vector<16x128xf32>
    %cst_31 = arith.constant dense<0.000000e+00> : vector<16xf32>
    %91 = vector.multi_reduction <add>, %90, %cst_31 [1] : vector<16x128xf32> to vector<16xf32>
    %92 = vector.shape_cast %91 : vector<16xf32> to vector<16x1xf32>
    %cst_32 = arith.constant 1.280000e+02 : f32
    %93 = vector.broadcast %cst_32 : f32 to vector<16x1xf32>
    %94 = arith.divf %92, %93 : vector<16x1xf32>
    %95 = vector.broadcast %87 : vector<16x1xf32> to vector<16x128xf32>
    %96 = arith.subf %81, %95 : vector<16x128xf32>
    %cst_33 = arith.constant 9.99999974E-6 : f32
    %97 = vector.broadcast %cst_33 : f32 to vector<16x1xf32>
    %98 = arith.addf %94, %97 : vector<16x1xf32>
    %99 = math.rsqrt %98 : vector<16x1xf32>
    %100 = vector.broadcast %99 : vector<16x1xf32> to vector<16x128xf32>
    %101 = arith.mulf %96, %100 : vector<16x128xf32>
    %102 = vector.broadcast %82 : vector<1x128xf32> to vector<16x128xf32>
    %103 = arith.mulf %101, %102 : vector<16x128xf32>
    %104 = vector.broadcast %83 : vector<1x128xf32> to vector<16x128xf32>
    %105 = arith.addf %103, %104 : vector<16x128xf32>
    %106 = arith.truncf %105 : vector<16x128xf32> to vector<16x128xbf16>
    %c0_34 = arith.constant 0 : index
    %c0_35 = arith.constant 0 : index
    %107 = vector.load %arg10[%c0_34, %c0_35] : memref<128x256xbf16, #tpu.memory_space<vmem>>, vector<128x256xbf16>
    %cst_36 = arith.constant dense<0.000000e+00> : vector<16x256xf32>
    %108 = tpu.matmul %106, %107, %cst_36 {dimension_numbers = #tpu.dot_dimension_numbers<[1], [0], [0], [1], [0, 0, 1, 1], [], []>} : vector<16x128xbf16>, vector<128x256xbf16>, vector<16x256xf32> -> vector<16x256xf32>
    %c0_37 = arith.constant 0 : index
    %c0_38 = arith.constant 0 : index
    %109 = vector.load %arg11[%c0_37, %c0_38] : memref<1x256xf32, #tpu.memory_space<vmem>>, vector<1x256xf32>
    %110 = vector.broadcast %109 : vector<1x256xf32> to vector<16x256xf32>
    %111 = arith.addf %108, %110 : vector<16x256xf32>
    %cst_39 = arith.constant 5.000000e-01 : f32
    %112 = vector.broadcast %cst_39 : f32 to vector<16x256xf32>
    %113 = arith.mulf %112, %111 : vector<16x256xf32>
    %cst_40 = arith.constant 4.471500e-02 : f32
    %114 = vector.broadcast %cst_40 : f32 to vector<16x256xf32>
    %115 = arith.mulf %114, %111 : vector<16x256xf32>
    %116 = arith.mulf %115, %111 : vector<16x256xf32>
    %117 = arith.mulf %116, %111 : vector<16x256xf32>
    %118 = arith.addf %111, %117 : vector<16x256xf32>
    %cst_41 = arith.constant 0.797884583 : f32
    %119 = vector.broadcast %cst_41 : f32 to vector<16x256xf32>
    %120 = arith.mulf %119, %118 : vector<16x256xf32>
    %121 = math.tanh %120 : vector<16x256xf32>
    %cst_42 = arith.constant 1.000000e+00 : f32
    %122 = vector.broadcast %cst_42 : f32 to vector<16x256xf32>
    %123 = arith.addf %122, %121 : vector<16x256xf32>
    %124 = arith.mulf %113, %123 : vector<16x256xf32>
    %125 = arith.truncf %124 : vector<16x256xf32> to vector<16x256xbf16>
    %c0_43 = arith.constant 0 : index
    %c0_44 = arith.constant 0 : index
    %126 = vector.load %arg12[%c0_43, %c0_44] : memref<256x128xbf16, #tpu.memory_space<vmem>>, vector<256x128xbf16>
    %cst_45 = arith.constant dense<0.000000e+00> : vector<16x128xf32>
    %127 = tpu.matmul %125, %126, %cst_45 {dimension_numbers = #tpu.dot_dimension_numbers<[1], [0], [0], [1], [0, 0, 1, 1], [], []>} : vector<16x256xbf16>, vector<256x128xbf16>, vector<16x128xf32> -> vector<16x128xf32>
    %c0_46 = arith.constant 0 : index
    %c0_47 = arith.constant 0 : index
    %128 = vector.load %arg13[%c0_46, %c0_47] : memref<1x128xf32, #tpu.memory_space<vmem>>, vector<1x128xf32>
    %129 = vector.broadcast %128 : vector<1x128xf32> to vector<16x128xf32>
    %130 = arith.addf %127, %129 : vector<16x128xf32>
    %131 = arith.addf %81, %130 : vector<16x128xf32>
    %132 = vector.shape_cast %131 : vector<16x128xf32> to vector<1x16x128xf32>
    %c0_48 = arith.constant 0 : index
    %c0_49 = arith.constant 0 : index
    %c0_50 = arith.constant 0 : index
    %133 = vector.load %arg14[%c0_48, %c0_49, %c0_50] : memref<1x16x128xf32, #tpu.memory_space<vmem>>, vector<1x16x128xf32>
    tpu.vector_store %arg14[%c0_48, %c0_49, %c0_50], %132 {strides = array<i32>} : memref<1x16x128xf32, #tpu.memory_space<vmem>>, vector<1x16x128xf32>,
    return
  }
  func.func @transform_0(%arg0: i32) -> (i32, i32, i32) {
    %c0_i32 = arith.constant 0 : i32
    %c0_i32_0 = arith.constant 0 : i32
    %c0_i32_1 = arith.constant 0 : i32
    return %arg0, %c0_i32, %c0_i32_0 : i32, i32, i32
  }
  func.func @transform_1(%arg0: i32) -> (i32, i32) {
    %c0_i32 = arith.constant 0 : i32
    %c0_i32_0 = arith.constant 0 : i32
    %c0_i32_1 = arith.constant 0 : i32
    return %c0_i32, %c0_i32_0 : i32, i32
  }
  func.func @transform_2(%arg0: i32) -> (i32, i32) {
    %c0_i32 = arith.constant 0 : i32
    %c0_i32_0 = arith.constant 0 : i32
    %c0_i32_1 = arith.constant 0 : i32
    return %c0_i32, %c0_i32_0 : i32, i32
  }
  func.func @transform_3(%arg0: i32) -> (i32, i32) {
    %c0_i32 = arith.constant 0 : i32
    %c0_i32_0 = arith.constant 0 : i32
    %c0_i32_1 = arith.constant 0 : i32
    return %c0_i32, %c0_i32_0 : i32, i32
  }
  func.func @transform_4(%arg0: i32) -> (i32, i32) {
    %c0_i32 = arith.constant 0 : i32
    %c0_i32_0 = arith.constant 0 : i32
    %c0_i32_1 = arith.constant 0 : i32
    return %c0_i32, %c0_i32_0 : i32, i32
  }
  func.func @transform_5(%arg0: i32) -> (i32, i32) {
    %c0_i32 = arith.constant 0 : i32
    %c0_i32_0 = arith.constant 0 : i32
    %c0_i32_1 = arith.constant 0 : i32
    return %c0_i32, %c0_i32_0 : i32, i32
  }
  func.func @transform_6(%arg0: i32) -> (i32, i32) {
    %c0_i32 = arith.constant 0 : i32
    %c0_i32_0 = arith.constant 0 : i32
    %c0_i32_1 = arith.constant 0 : i32
    return %c0_i32, %c0_i32_0 : i32, i32
  }
  func.func @transform_7(%arg0: i32) -> (i32, i32) {
    %c0_i32 = arith.constant 0 : i32
    %c0_i32_0 = arith.constant 0 : i32
    %c0_i32_1 = arith.constant 0 : i32
    return %c0_i32, %c0_i32_0 : i32, i32
  }
  func.func @transform_8(%arg0: i32) -> (i32, i32) {
    %c0_i32 = arith.constant 0 : i32
    %c0_i32_0 = arith.constant 0 : i32
    %c0_i32_1 = arith.constant 0 : i32
    return %c0_i32, %c0_i32_0 : i32, i32
  }
  func.func @transform_9(%arg0: i32) -> (i32, i32) {
    %c0_i32 = arith.constant 0 : i32
    %c0_i32_0 = arith.constant 0 : i32
    %c0_i32_1 = arith.constant 0 : i32
    return %c0_i32, %c0_i32_0 : i32, i32
  }
  func.func @transform_10(%arg0: i32) -> (i32, i32) {
    %c0_i32 = arith.constant 0 : i32
    %c0_i32_0 = arith.constant 0 : i32
    %c0_i32_1 = arith.constant 0 : i32
    return %c0_i32, %c0_i32_0 : i32, i32
  }
  func.func @transform_11(%arg0: i32) -> (i32, i32) {
    %c0_i32 = arith.constant 0 : i32
    %c0_i32_0 = arith.constant 0 : i32
    %c0_i32_1 = arith.constant 0 : i32
    return %c0_i32, %c0_i32_0 : i32, i32
  }
  func.func @transform_12(%arg0: i32) -> (i32, i32) {
    %c0_i32 = arith.constant 0 : i32
    %c0_i32_0 = arith.constant 0 : i32
    %c0_i32_1 = arith.constant 0 : i32
    return %c0_i32, %c0_i32_0 : i32, i32
  }
  func.func @transform_13(%arg0: i32) -> (i32, i32, i32) {
    %c0_i32 = arith.constant 0 : i32
    %c0_i32_0 = arith.constant 0 : i32
    %c0_i32_1 = arith.constant 0 : i32
    return %arg0, %c0_i32, %c0_i32_0 : i32, i32, i32
  }
}

</mosaic_0001>

<bundles_post_ra>
// kernel: tpu_custom_call.1
= control target key start
LH: loop header
LB: loop body
LE: loop exit
PB: predicated region body
PF: predicated region fallthrough
CT: control target
= control target key end

     0   :  { %s3234_s0 = inlined_call_operand.hbm [shape: f32[2,16,128], index: 0, kind: input, shape index: {}]   ;;  %s3235_s1 = inlined_call_operand.vmem [shape: f32[1,128], index: 1, kind: input, shape index: {}]   ;;  %s3236_s2 = inlined_call_operand.vmem [shape: f32[1,128], index: 2, kind: input, shape index: {}]   ;;  %s3237_s3 = inlined_call_operand.hbm [shape: bf16[128,384], index: 3, kind: input, shape index: {}]   ;;  %s3238_s4 = inlined_call_operand.vmem [shape: f32[1,384], index: 4, kind: input, shape index: {}]   ;;  %s3239_s5 = inlined_call_operand.hbm [shape: bf16[128,128], index: 5, kind: input, shape index: {}]   ;;  %s3240_s6 = inlined_call_operand.vmem [shape: f32[1,128], index: 6, kind: input, shape index: {}]   ;;  %s3241_s7 = inlined_call_operand.vmem [shape: f32[1,128], index: 7, kind: input, shape index: {}]   ;;  %s3242_s8 = inlined_call_operand.vmem [shape: f32[1,128], index: 8, kind: input, shape index: {}]   ;;  %s3243_s9 = inlined_call_operand.hbm [shape: bf16[128,256], index: 9, kind: input, shape index: {}]   ;;  %s3244_s10 = inlined_call_operand.vmem [shape: f32[1,256], index: 10, kind: input, shape index: {}]   ;;  %s3245_s11 = inlined_call_operand.hbm [shape: bf16[256,128], index: 11, kind: input, shape index: {}]   ;;  %s3246_s12 = inlined_call_operand.vmem [shape: f32[1,128], index: 12, kind: input, shape index: {}]   ;;  %s3247_s13 = inlined_call_operand.hbm [shape: f32[2,16,128], index: 13, kind: output, shape index: {}]  }
   0x1   :  { %3256 = sst [smem:[#allocation18_spill]] %s3237_s3 }
   0x2   :  { %3257 = sst [smem:[#allocation19_spill]] %s3242_s8 }
   0x3   :  { %3258 = sst [smem:[#allocation20_spill]] %s3244_s10 }
   0x4   :  { %3259 = sst [smem:[#allocation21_spill]] %s3246_s12 }
   0x5   :  { %3260 = sst [smem:[#allocation22_spill]] %s3247_s13 }
   0x6   :  { %18 = vsyncpa [#allocation3], 0 }
   0x7   :  { %20 = vsyncpa [#allocation3 + $0x1], 0 }
   0x8   :  { %21 = vsyncpa [#allocation6], 0 }
   0x9   :  { %22 = vsyncpa [#allocation9], 0 }
   0xa   :  { %23 = vsyncpa [#allocation4], 0 }
   0xb   :  { %25 = vsyncpa [#allocation4 + $0x1], 0  ;;  %s2776_s25 = smov 0   ;;  %s2778_s26 = smov 0  }
   0xc   :  { %s2780_s27 = smov 0   ;;  %s2782_s28 = smov 0  }
   0xd LB: > { %3261 = sst [smem:[#allocation16_spill]] %s2672_s25  ;;  %s2797_s29 = sadd.s32 4294967295, %s2684_s28   ;;  %s2684_s28 = sphi %s2782_s28, %s3291_s28   ;;  %s2680_s27 = sphi %s2780_s27, %s3290_s27   ;;  %s2676_s26 = sphi %s2778_s26, %s3289_s26   ;;  %s2672_s25 = sphi %s2776_s25, %s3288_s25  }
   0xe   : > { %s1993_s30 = sadd.s32 4294967294, %s2684_s28   ;;  %p51_p0 = scmp.ne.s32.totalorder %s2676_s26, %s2672_s25 }
   0xf   : > { %p3250_p1 = scmp.eq.s32.totalorder %s2797_s29, 0  ;;  %p333_p3 = scmp.eq.s32.totalorder %s1993_s30, 1 }
  0x10   : > { %p1994_p5 = scmp.ge.s32.totalorder %s2684_s28, 1  ;;  %p340_p7 = scmp.lt.s32.totalorder %s2684_s28, 3 }
  0x11   : > { %p2806_p4 = por %p3250_p1, %p51_p0  ;;  %p2811_p6 = por %p333_p3, %p51_p0 }
  0x12   : > { %p2816_p8 = pnand %p1994_p5, %p340_p7  ;;  %s2686_s17 = smov [#allocation5]  }
  0x13   : > { %s3262_s14 = scalar_select %p2806_p4, 1, 0 }
  0x14   : > { %s3263_s15 = scalar_select %p2811_p6, 1, 0 }
  0x15   : > { %s3265_s16 = scalar_select %p2816_p8, 1, 0 }
  0x16   : > { %3264 = sst [smem:[#allocation17_spill]] %s3263_s15  ;;  %s358_s18 = sshll.u32 %s2686_s17, 4  ;;  %s2820_s18 = int_to_ptr.vmem [resolvable:$true] %s358_s18 }
  0x17   : > { %p2259_p9 = pneg %p2816_p8  ;;  %s2687_s20 = smov [#allocation8]  }
  0x18   : > { %s396_s21 = sshll.u32 %s2687_s20, 4  ;;  %s3267_s3 = sld [smem:[#allocation18_spill]]  ;;  %s2831_s21 = int_to_ptr.vmem [resolvable:$true] %s396_s21 }
  0x19   : > { %p2827_p11 = pnand %p2259_p9, %p3250_p1 }
  0x1b   : > { %p2841_p13 = pneg %p2827_p11 }
  0x1e   : > { %s2468_s24 = scalar_lea.hbm %s3267_s3, 3072 }
  0x1f   : > { %p2469_p12 = scmp.ne.s32.totalorder %s3267_s3, %s2468_s24  ;;  %p2475_p5 = scmp.lt.u32.totalorder %s2468_s24, %s3267_s3 }
  0x21   : > { %p2471_p0 = pnand %p2841_p13, %p2469_p12 }
  0x23   : > { %p2472_p3 = pneg %p2471_p0 }
  0x25   : > { %p2477_p7 = pnand %p2475_p5, %p2472_p3 }
  0x27   : > { %2480 = shalt.err (!%p2477_p7)
}
  0x28   : > { %s2481_s22 = scalar_lea.vmem %s2820_s18, 3072  ;;  %p2489_p2 = scmp.lt.s32.totalorder %s2820_s18, %s2820_s18 }
  0x29   : > { %p2482_p9 = scmp.ne.s32.totalorder %s2820_s18, %s2481_s22  ;;  %p2490_p6 = scmp.lt.s32.totalorder %s2481_s22, %s2481_s22 }
  0x2b   : > { %p2484_p10 = pnand %p2482_p9, %p2841_p13  ;;  %p2491_p12 = por %p2490_p6, %p2489_p2 }
  0x2d   : > { %p2485_p1 = pneg %p2484_p10 }
  0x2f   : > { %p2492_p0 = pnand %p2491_p12, %p2485_p1 }
  0x31   : > { %2495 = shalt.err (!%p2492_p0)
}
  0x32   : > { %s2688_s23 = smov 192   ;;  %s2689_s25 = smov 12  }
  0x33   : > { %2262 = dma.hbm_to_vmem [thread:$0]  (!%p2827_p11), %s3267_s3, 3072, %s2820_s18, [#allocation6], %s2688_s23, %s2688_s23, %s2689_s25  }
  0x34   : > { %s2496_s13 = scalar_lea.hbm %s3243_s9, 2048 }
  0x35   : > { %p2497_p2 = scmp.ne.s32.totalorder %s3243_s9, %s2496_s13  ;;  %p2503_p10 = scmp.lt.u32.totalorder %s2496_s13, %s3243_s9 }
  0x37   : > { %p2499_p1 = pnand %p2497_p2, %p2841_p13 }
  0x39   : > { %p2500_p6 = pneg %p2499_p1 }
  0x3b   : > { %p2505_p3 = pnand %p2503_p10, %p2500_p6 }
  0x3d   : > { %2508 = shalt.err (!%p2505_p3)
}
  0x3e   : > { %s2509_s18 = scalar_lea.vmem %s2831_s21, 2048  ;;  %p2517_p12 = scmp.lt.s32.totalorder %s2831_s21, %s2831_s21 }
  0x3f   : > { %p2510_p5 = scmp.ne.s32.totalorder %s2831_s21, %s2509_s18  ;;  %p2518_p0 = scmp.lt.s32.totalorder %s2509_s18, %s2509_s18 }
  0x41   : > { %p2512_p7 = pnand %p2510_p5, %p2841_p13  ;;  %p2519_p2 = por %p2518_p0, %p2517_p12 }
  0x43   : > { %p2513_p9 = pneg %p2512_p7 }
  0x45   : > { %p2520_p1 = pnand %p2519_p2, %p2513_p9 }
  0x47   : > { %2523 = shalt.err (!%p2520_p1)
}
  0x48   : > { %s3254_s10 = smov 128   ;;  %s3255_s8 = smov 8  }
  0x49   : > { %2268 = dma.hbm_to_vmem [thread:$0]  (!%p2827_p11), %s3243_s9, 2048, %s2831_s21, [#allocation9], %s3254_s10, %s3254_s10, %s3255_s8  }
  0x4a   : > { %s2692_s23 = smov [#allocation7]   ;;  %s2524_s17 = scalar_lea.hbm %s3239_s5, 1024 }
  0x4b   : > { %s374_s25 = sshll.u32 %s2692_s23, 4  ;;  %p2525_p6 = scmp.ne.s32.totalorder %s3239_s5, %s2524_s17  ;;  %s375_s25 = int_to_ptr.vmem [resolvable:$true] %s374_s25 }
  0x4c   : > { %p2531_p5 = scmp.lt.u32.totalorder %s2524_s17, %s3239_s5 }
  0x4d   : > { %p2527_p10 = pnand %p2525_p6, %p2841_p13 }
  0x4f   : > { %p2528_p3 = pneg %p2527_p10 }
  0x51   : > { %p2533_p7 = pnand %p2531_p5, %p2528_p3 }
  0x53   : > { %2536 = shalt.err (!%p2533_p7)
}
  0x54   : > { %s2537_s21 = scalar_lea.vmem %s375_s25, 1024  ;;  %p2545_p2 = scmp.lt.s32.totalorder %s375_s25, %s375_s25 }
  0x55   : > { %p2538_p9 = scmp.ne.s32.totalorder %s375_s25, %s2537_s21  ;;  %p2546_p1 = scmp.lt.s32.totalorder %s2537_s21, %s2537_s21 }
  0x57   : > { %p2540_p12 = pnand %p2538_p9, %p2841_p13  ;;  %p2547_p4 = por %p2546_p1, %p2545_p2 }
  0x59   : > { %p2541_p0 = pneg %p2540_p12 }
  0x5b   : > { %p2548_p8 = pnand %p2547_p4, %p2541_p0 }
  0x5d   : > { %2551 = shalt.err (!%p2548_p8)
}
  0x5e   : > { %s2693_s12 = smov 64   ;;  %s2694_s13 = smov 4  }
  0x5f   : > { %2265 = dma.hbm_to_vmem [thread:$0]  (!%p2827_p11), %s3239_s5, 1024, %s375_s25, [#allocation6], %s2693_s12, %s2693_s12, %s2694_s13  }
  0x60   : > { %s2695_s24 = smov [#allocation10]   ;;  %s2552_s22 = scalar_lea.hbm %s3245_s11, 2048 }
  0x61   : > { %s412_s30 = sshll.u32 %s2695_s24, 4  ;;  %p2553_p4 = scmp.ne.s32.totalorder %s3245_s11, %s2552_s22  ;;  %s413_s30 = int_to_ptr.vmem [resolvable:$true] %s412_s30 }
  0x62   : > { %p2559_p10 = scmp.lt.u32.totalorder %s2552_s22, %s3245_s11 }
  0x63   : > { %p2555_p8 = pnand %p2553_p4, %p2841_p13 }
  0x65   : > { %p2556_p6 = pneg %p2555_p8 }
  0x67   : > { %p2561_p3 = pnand %p2559_p10, %p2556_p6 }
  0x69   : > { %2564 = shalt.err (!%p2561_p3)
}
  0x6a   : > { %s2565_s25 = scalar_lea.vmem %s413_s30, 2048  ;;  %p2573_p12 = scmp.lt.s32.totalorder %s413_s30, %s413_s30 }
  0x6b   : > { %p2566_p5 = scmp.ne.s32.totalorder %s413_s30, %s2565_s25  ;;  %p2574_p0 = scmp.lt.s32.totalorder %s2565_s25, %s2565_s25 }
  0x6d   : > { %p2568_p7 = pnand %p2566_p5, %p2841_p13  ;;  %p2575_p2 = por %p2574_p0, %p2573_p12 }
  0x6f   : > { %p2569_p9 = pneg %p2568_p7 }
  0x71   : > { %p2576_p1 = pnand %p2575_p2, %p2569_p9 }
  0x73   : > { %2579 = shalt.err (!%p2576_p1)
}
  0x74   : > { %2271 = dma.hbm_to_vmem [thread:$0]  (!%p2827_p11), %s3245_s11, 2048, %s413_s30, [#allocation9], %s2693_s12, %s2693_s12, %s2694_s13  }
  0x75   : > { %s2925_s15 = sadd.s32 1, %s2684_s28   ;;  %s38_s10 = sadd.s32 1, %s2680_s27 }
  0x76   : > { %s35_s19 = ssub.s32 %s2684_s28, %s2925_s15  ;;  %p45_p13 = scmp.ne.s32.totalorder %s2680_s27, %s2676_s26 }
  0x77   : > { %p36_p4 = scmp.eq.s32.totalorder %s35_s19, 0  ;;  %p46_p8 = scmp.eq.s32.totalorder %s2684_s28, 0 }
  0x78   : > { %p3269_p6 = scmp.eq.s32.totalorder %s2797_s29, 1  ;;  %p2284_p3 = scmp.lt.s32.totalorder %s2684_s28, 2 }
  0x79   : > { %s2941_s24 = scalar_select %p36_p4, %s2680_s27, %s38_s10  }
  0x7a   : > { %p2935_p10 = por %p3269_p6, %p45_p13  ;;  %p47_p5 = por %p46_p8, %p45_p13 }
  0x7b   : > { %s429_s17 = sand.u32 1, %s2680_s27   ;;  %s2093_s12 = sshll.u32 %s2684_s28, 8 }
  0x7c   : > { %s2000_s20 = sshll.u32 %s429_s17, 4  ;;  %s2948_s22 = scalar_lea.hbm %s3234_s0, %s2093_s12 }
  0x7d   : > { %s433_s18 = scalar_lea.vmem [#allocation2], %s2000_s20  ;;  %p2952_p11 = pnand %p2284_p3, %p47_p5 }
  0x7e   : > { %s440_s21 = sshll.u32 %s433_s18, 4  ;;  %s2956_s3 = scalar_lea.sflag [#allocation3], %s429_s17  ;;  %s2950_s21 = int_to_ptr.vmem [resolvable:$true] %s440_s21 }
  0x7f   : > { %s2580_s23 = scalar_lea.hbm %s2948_s22, 256  ;;  %p2582_p9 = pneg %p2952_p11 }
  0x80   : > { %p2581_p7 = scmp.ne.s32.totalorder %s2948_s22, %s2580_s23  ;;  %s2585_s20 = scalar_lea.hbm %s3234_s0, 512 }
  0x81   : > { %p2586_p2 = scmp.lt.u32.totalorder %s2948_s22, %s3234_s0  ;;  %p2587_p1 = scmp.lt.u32.totalorder %s2585_s20, %s2580_s23 }
  0x82   : > { %p2583_p12 = pnand %p2582_p9, %p2581_p7  ;;  %p2589_p4 = scmp.lt.u32.totalorder %s2580_s23, %s2948_s22 }
  0x83   : > { %p2588_p13 = por %p2587_p1, %p2586_p2 }
  0x84   : > { %p2584_p0 = pneg %p2583_p12 }
  0x85   : > { %p2590_p8 = por %p2589_p4, %p2588_p13 }
  0x87   : > { %p2591_p6 = pnand %p2590_p8, %p2584_p0 }
  0x89   : > { %2594 = shalt.err (!%p2591_p6)
}
  0x8a   : > { %s2595_s17 = scalar_lea.vmem %s2950_s21, 256  ;;  %s2696_s30 = smov [#allocation2]  }
  0x8b   : > { %p2596_p3 = scmp.ne.s32.totalorder %s2950_s21, %s2595_s17  ;;  %s2600_s18 = sshll.u32 %s2696_s30, 4  ;;  %s2601_s18 = int_to_ptr.vmem [resolvable:$false] %s2600_s18 }
  0x8c   : > { %s2602_s10 = scalar_lea.vmem %s2601_s18, 512  ;;  %p2603_p12 = scmp.lt.s32.totalorder %s2950_s21, %s2601_s18 }
  0x8d   : > { %p2598_p5 = pnand %p2596_p3, %p2582_p9  ;;  %p2604_p2 = scmp.lt.s32.totalorder %s2602_s10, %s2595_s17 }
  0x8f   : > { %p2599_p7 = pneg %p2598_p5  ;;  %p2605_p1 = por %p2604_p2, %p2603_p12 }
  0x91   : > { %p2606_p13 = pnand %p2605_p1, %p2599_p7 }
  0x93   : > { %2609 = shalt.err (!%p2606_p13)
}
  0x94   : > { %s3272_s23 = smov 8   ;;  %s3273_s19 = smov 128  }
  0x95   : > { %2275 = dma.hbm_to_vmem [thread:$0]  (!%p2952_p11), %s2948_s22, 256, %s2950_s21, %s2956_s3, %s3273_s19, %s3273_s19, %s3272_s23  }
  0x96   : > { %p3274_p9 = scmp.ne.s32.totalorder %s3265_s16, 0 }
  0x97   : > { %s2990_s20 = sand.u32 (!%p3274_p9), 1, %s2676_s26   ;;  %p3275_p0 = scmp.ne.s32.totalorder (!%p3274_p9), %s3262_s14, 0 }
  0x98   : > { %452 = sbr.rel (%p3274_p9) target bundleno = 2765 (0xacd), region = 72  ;;  %s2004_s12 = sshll.u32 (!%p3274_p9), %s2990_s20, 4 }
  0x99   : > { %s455_s13 = scalar_lea.sflag (!%p3274_p9), [#allocation3], %s2990_s20  ;;  %s458_s25 = scalar_lea.vmem (!%p3274_p9), [#allocation2], %s2004_s12 }
  0x9f   : > { %2655 = dma.done.wait (%p3275_p0), %s455_s13, 256  }
  0xa0   : > { %2657 = vsyncadd (%p3275_p0), %s455_s13, 4294967040  ;;  %p3276_p11 = scmp.eq.s32.totalorder %s2797_s29, 0 }
  0xa2   : > { %2659 = dma.done.wait (%p3276_p11), [#allocation6], 4096   ;;  %p3277_p4 = pmov %p3276_p11 }
  0xa4   : > { %2661 = vsyncadd (%p3277_p4), [#allocation6], 4294963200  ;;  %p3278_p8 = pmov %p3277_p4 }
  0xa5   : > { %p3279_p6 = pmov %p3277_p4 }
  0xa6   : > { %2663 = dma.done.wait (%p3278_p8), [#allocation9], 4096  }
  0xa7   : > { %2665 = vsyncadd (%p3279_p6), [#allocation9], 4294963200  ;;  %v3008_v0 = vld [vmem:[%s458_s25] sm:$0xff]  ;;  %v3010_v1 = vld [vmem:[%s458_s25 + $0x8] sm:$0xff]  ;;  %v2697_v4 = vmov 0.0   ;;  %v2698_v30 = vmov 0   ;;  %v596_v53 = vlaneseq }
  0xa8   : > { %522 = vadd.xlane.f32.xlu0 %v3008_v0  ;;  %v2340_v2 = vld [vmem:[#allocation5 + $0x4] ss:$12 sps:$4 sm:$0xff]   ;;  %v2342_v3 = vld [vmem:[#allocation5] ss:$12 sps:$4 sm:$0xff]   ;;  %2151 = vmatprep.subr.bf16.mxu1 %v2697_v4  ;;  %v2343_v5 = vld [vmem:[#allocation5 + $0x8] ss:$12 sps:$4 sm:$0xff]  }
  0xa9   : > { %v2344_v6 = vld [vmem:[#allocation5 + $0x1c] ss:$12 sps:$4 sm:$0xff]   ;;  %739 = vmatprep.subr.bf16.mxu0 %v2340_v2  ;;  %2152 = vmatpush3.bf16.msra.mxu1 %v2343_v5  ;;  %v2346_v15 = vld [vmem:[#allocation5 + $0x18] ss:$12 sps:$4 sm:$0xff]   ;;  %v2347_v16 = vld [vmem:[#allocation5 + $0x20] ss:$12 sps:$4 sm:$0xff]  }
  0xaa   : > { %740 = vmatpush1.bf16.msra.mxu0 %v2342_v3  ;;  %2153 = vmatprep.subr.bf16.mxu1 %v2697_v4  ;;  %v2348_v17 = vld [vmem:[#allocation5 + $0x34] ss:$12 sps:$4 sm:$0xff]   ;;  %v2350_v18 = vld [vmem:[#allocation5 + $0x30] ss:$12 sps:$4 sm:$0xff]   ;;  %v2351_v19 = vld [vmem:[#allocation5 + $0x38] ss:$12 sps:$4 sm:$0xff]  }
  0xab   : > { %741 = vmatprep.subr.bf16.mxu0 %v2344_v6  ;;  %v2352_v20 = vld [vmem:[#allocation5 + $0x4c] ss:$12 sps:$4 sm:$0xff]   ;;  %v2354_v21 = vld [vmem:[#allocation5 + $0x48] ss:$12 sps:$4 sm:$0xff]   ;;  %v2355_v22 = vld [vmem:[#allocation5 + $0x50] ss:$12 sps:$4 sm:$0xff]   ;;  %771 = vmatprep.mubr.bf16.mxu0 %v2698_v30 }
  0xac   : > { %524 = vadd.xlane.f32.xlu0 %v3010_v1  ;;  %v2356_v23 = vld [vmem:[#allocation5 + $0x64] ss:$12 sps:$4 sm:$0xff]   ;;  %v2358_v24 = vld [vmem:[#allocation5 + $0x60] ss:$12 sps:$4 sm:$0xff]   ;;  %v2359_v25 = vld [vmem:[#allocation5 + $0x68] ss:$12 sps:$4 sm:$0xff]  }
  0xad   : > { %2154 = vmatpush3.bf16.msra.mxu1 %v2347_v16  ;;  %v2360_v26 = vld [vmem:[#allocation5 + $0x7c] ss:$12 sps:$4 sm:$0xff]   ;;  %v2362_v27 = vld [vmem:[#allocation5 + $0x78] ss:$12 sps:$4 sm:$0xff]   ;;  %v2363_v28 = vld [vmem:[#allocation5 + $0x80] ss:$12 sps:$4 sm:$0xff]  }
  0xae   : > { %742 = vmatpush1.bf16.msra.mxu0 %v2346_v15  ;;  %2155 = vmatprep.subr.bf16.mxu1 %v2697_v4  ;;  %v2364_v29 = vld [vmem:[#allocation5 + $0x94] ss:$12 sps:$4 sm:$0xff]   ;;  %vm2699_vm0 = vmmov 0   ;;  %v2366_v31 = vld [vmem:[#allocation5 + $0x90] ss:$12 sps:$4 sm:$0xff]   ;;  %v3050_v54 = vshrl.u32 %v596_v53, 7 }
  0xaf   : > { %743 = vmatprep.subr.bf16.mxu0 %v2348_v17  ;;  %2167 = vmatprep.mubr.msk.bf16.mxu1 %vm2699_vm0, %v2697_v4  ;;  %v2367_v32 = vld [vmem:[#allocation5 + $0x98] ss:$12 sps:$4 sm:$0xff]   ;;  %v2370_v34 = vld [vmem:[#allocation5 + $0xa8] ss:$12 sps:$4 sm:$0xff]   ;;  %v2371_v35 = vld [vmem:[#allocation5 + $0xb0] ss:$12 sps:$4 sm:$0xff]  }
  0xb0   : > { %v2368_v33 = vld [vmem:[#allocation5 + $0xac] ss:$12 sps:$4 sm:$0xff]   ;;  %v2010_v44 = vld [vmem:[%s3235_s1] ss:$0 sm:$0xff]  ;;  %v598_v55 = vsub.s32 0, %v3050_v54  ;;  %v606_v56 = vsub.s32 2, %v3050_v54 }
  0xb1   : > { %2156 = vmatpush3.bf16.msra.mxu1 %v2351_v19  ;;  %v2011_v48 = vld [vmem:[%s3236_s2] ss:$0 sm:$0xff]  ;;  %v602_v58 = vsub.s32 1, %v3050_v54  ;;  %vm850_vm1 = vcmask 261120   ;;  %s2700_s30 = smov 96   ;;  %s2701_s18 = smov 64  }
  0xb2   : > { %744 = vmatpush1.bf16.msra.mxu0 %v2350_v18  ;;  %2157 = vmatprep.subr.bf16.mxu1 %v2697_v4  ;;  %v594_v57 = vld [vmem:[%s3238_s4] sm:$0x7]  ;;  %s2702_s10 = smov 32   ;;  %vm1052_vm3 = vcmask 130048   ;;  %vm1337_vm4 = vcmask 523264   ;;  %vm1340_vm5 = vcmask 785408  }
  0xb3   : > { %745 = vmatprep.subr.bf16.mxu0 %v2352_v20  ;;  %v599_v59 = vrot.slane %v594_v57, %v598_v55  ;;  %v607_v60 = vrot.slane %v594_v57, %v606_v56  ;;  %v603_v63 = vrot.slane %v594_v57, %v602_v58  ;;  %s3280_s22 = sld [smem:[#allocation19_spill]]  ;;  %s3281_s17 = sld [smem:[#allocation20_spill]] }
  0xb4   : > { %s516_s23 = scalar_lea.vmem [#allocation11], %s2004_s12  ;;  %s2094_s13 = sshll.u32 %s2797_s29, 8 }
  0xb5   : > { %2158 = vmatpush3.bf16.msra.mxu1 %v2355_v22  ;;  %s1882_s19 = sshll.u32 %s516_s23, 4  ;;  %s3283_s16 = sld [smem:[#allocation22_spill]]  ;;  %s3184_s19 = int_to_ptr.vmem [resolvable:$true] %s1882_s19 }
  0xb6   : > { %746 = vmatpush1.bf16.msra.mxu0 %v2354_v21  ;;  %2159 = vmatprep.subr.bf16.mxu1 %v2697_v4  ;;  %s1869_s12 = scalar_lea.sflag [#allocation4], %s2990_s20  ;;  %s2610_s21 = scalar_lea.vmem %s3184_s19, 256 }
  0xb7   : > { %747 = vmatprep.subr.bf16.mxu0 %v2356_v23  ;;  %p2611_p3 = scmp.ne.s32.totalorder %s3184_s19, %s2610_s21  ;;  %s2703_s29 = smov [#allocation11]  }
  0xb8   : > { %s2614_s3 = sshll.u32 %s2703_s29, 4  ;;  %s2615_s3 = int_to_ptr.vmem [resolvable:$false] %s2614_s3 }
  0xb9   : > { %2160 = vmatpush3.bf16.msra.mxu1 %v2359_v25  ;;  %p2612_p5 = pnand %p2611_p3, %p2935_p10  ;;  %p2617_p12 = scmp.lt.s32.totalorder %s3184_s19, %s2615_s3 }
  0xba   : > { %748 = vmatpush1.bf16.msra.mxu0 %v2358_v24  ;;  %2161 = vmatprep.subr.bf16.mxu1 %v2697_v4 }
  0xbb   : > { %749 = vmatprep.subr.bf16.mxu0 %v2360_v26  ;;  %p2613_p7 = pneg %p2612_p5 }
  0xbd   : > { %2162 = vmatpush3.bf16.msra.mxu1 %v2363_v28  ;;  %v1040_v28 = vand.u32 127, %v596_v53 }
  0xbe   : > { %750 = vmatpush1.bf16.msra.mxu0 %v2362_v27  ;;  %2163 = vmatprep.subr.bf16.mxu1 %v2697_v4 }
  0xbf   : > { %751 = vmatprep.subr.bf16.mxu0 %v2364_v29  ;;  %vm1041_vm2 = vcmp.lt.s32.totalorder %v1040_v28, 13 }
  0xc1   : > { %2164 = vmatpush3.bf16.msra.mxu1 %v2367_v32 }
  0xc2   : > { %752 = vmatpush1.bf16.msra.mxu0 %v2366_v31  ;;  %2165 = vmatprep.subr.bf16.mxu1 %v2697_v4 }
  0xc3   : > { %753 = vmatprep.subr.bf16.mxu0 %v2368_v33 }
  0xc5   : > { %2166 = vmatpush3.bf16.msra.mxu1 %v2371_v35 }
  0xc6   : > { %754 = vmatpush1.bf16.msra.mxu0 %v2370_v34  ;;  %2171 = vmatprep.subr.bf16.mxu1 %v2697_v4 }
  0xc7   : > { %2195 = vmatprep.subr.bf16.mxu0 %v2697_v4 }
 0x135   : > { %v523_v7 = vpop.xlane.xlu0 %522 }
 0x136   : > { %v527_v8 = vmul.f32 0.0078125, %v523_v7 }
 0x138   : > { %v3017_v9 = vsub.f32 %v3008_v0, %v527_v8 }
 0x139   : > { %v525_v10 = vpop.xlane.xlu0 %524 }
 0x13a   : > { %v528_v11 = vmul.f32 0.0078125, %v525_v10  ;;  %v531_v12 = vmul.f32 %v3017_v9, %v3017_v9 }
 0x13c   : > { %v3022_v13 = vsub.f32 %v3010_v1, %v528_v11  ;;  %533 = vadd.xlane.f32.xlu1 %v531_v12 }
 0x13e   : > { %v532_v14 = vmul.f32 %v3022_v13, %v3022_v13 }
 0x140   : > { %535 = vadd.xlane.f32.xlu1 %v532_v14 }
 0x1c9   : > { %v534_v36 = vpop.xlane.xlu1 %533 }
 0x1ca   : > { %v537_v37 = vmul.f32 0.0078125, %v534_v36 }
 0x1cc   : > { %v539_v38 = vadd.f32 1e-05, %v537_v37 }
 0x1cd   : > { %v536_v39 = vpop.xlane.xlu1 %535 }
 0x1ce   : > { %2420 = vrsqrt.f32 %v539_v38  ;;  %v538_v40 = vmul.f32 0.0078125, %v536_v39 }
 0x1d0   : > { %v540_v41 = vadd.f32 1e-05, %v538_v40 }
 0x1d2   : > { %2422 = vrsqrt.f32 %v540_v41 }
 0x1d8   : > { %v2421_v42 = vpop.eup %2420 }
 0x1d9   : > { %v543_v43 = vmul.f32 %v2421_v42, %v3017_v9 }
 0x1db   : > { %v551_v47 = vmul.f32 %v2010_v44, %v543_v43 }
 0x1dc   : > { %v2423_v45 = vpop.eup %2422 }
 0x1dd   : > { %v544_v46 = vmul.f32 %v2423_v45, %v3022_v13  ;;  %v559_v50 = vadd.f32 %v2011_v48, %v551_v47 }
 0x1df   : > { %v552_v49 = vmul.f32 %v2010_v44, %v544_v46 }
 0x1e1   : > { %v560_v51 = vadd.f32 %v2011_v48, %v552_v49 }
 0x1e3   : > { %v561_v52 = vpack.c.bf16 %v560_v51, %v559_v50 }
 0x1e5   : > { %772 = vmatmul.mubr.bf16.vlgmr.msra.gmra.mrb[0].mxu0 %v561_v52  ;;  %2168 = vmatmul.mubr.bf16.vlgmr.msra.gmra.mrb[0].mxu1 %v561_v52 }
 0x1e6   : > { %2173 = vmatprep.mubr.msk.bf16.mxu1 %vm2699_vm0, %v2697_v4  ;;  %2197 = vmatprep.mubr.msk.bf16.mxu0 %vm2699_vm0, %v2697_v4 }
 0x2b8   : > { %v773_v61 = vpop.f32.mrb[0].mxu0  ;;  %v816_v62 = vpop.f32.mrb[0].mxu1 }
 0x2b9   : > { %v775_v2 = vpop.f32.mrb[1].mxu0  ;;  %v2169_v3 = vpop.f32.mrb[1].mxu1  ;;  %v774_v7 = vadd.f32 %v773_v61, %v599_v59  ;;  %v817_v8 = vadd.f32 %v816_v62, %v607_v60 }
 0x2ba   : > { %v777_v5 = vpop.f32.mrb[2].mxu0  ;;  %v819_v6 = vpop.f32.mrb[2].mxu1  ;;  %v776_v13 = vadd.f32 %v775_v2, %v603_v63 }
 0x2bb   : > { %v778_v9 = vadd.f32 %v777_v5, %v599_v59  ;;  %v820_v10 = vadd.f32 %v819_v6, %v607_v60  ;;  %v779_v11 = vpop.f32.mrb[3].mxu0  ;;  %v2170_v12 = vpop.f32.mrb[3].mxu1 }
 0x2bc   : > { %v780_v14 = vadd.f32 %v779_v11, %v603_v63 }
 0x2bd   : > { %v823_v15 = vpack.c.bf16 %v778_v9, %v774_v7  ;;  %v3062_v16 = vpack.c.bf16 %v820_v10, %v817_v8 }
 0x2be   : > { %v824_v17 = vpack.c.bf16 %v780_v14, %v776_v13 }
 0x2bf   : > { %2196 = vmatpush3.bf16.msra.mxu0 %v3062_v16  ;;  %827 = vrot.lane.b32.xlu1 %v823_v15, %s2700_s30 }
 0x2c0   : > { %834 = vrot.lane.b32.xlu0 %v824_v17, %s2700_s30  ;;  %v855_v18 = vsel %vm850_vm1, %v824_v17, 0  ;;  %2207 = vmatprep.subr.bf16.mxu0 %v2697_v4 }
 0x2c1   : > { %2172 = vmatpush3.bf16.xpose.msra.mxu1 %v855_v18 }
 0x2c2   : > { %2177 = vmatprep.subr.bf16.mxu1 %v2697_v4 }
 0x2c3   : > { %836 = vrot.lane.b32.xlu1 %v824_v17, %s2701_s18 }
 0x2c4   : > { %838 = vrot.lane.b32.xlu0 %v824_v17, %s2702_s10 }
 0x2c7   : > { %829 = vrot.lane.b32.xlu1 %v823_v15, %s2701_s18 }
 0x2c8   : > { %2174 = vmatmul.mubr.msk.bf16.vlgmr.msra.gmra.mrb[4].mxu1 %vm850_vm1, %v823_v15 }
 0x2c9   : > { %2179 = vmatprep.mubr.msk.bf16.mxu1 %vm2699_vm0, %v2697_v4 }
 0x2cb   : > { %831 = vrot.lane.b32.xlu1 %v823_v15, %s2702_s10 }
 0x331   : > { %v828_v19 = vpop.permute.xlu1 %827 }
 0x332   : > { %v835_v20 = vpop.permute.xlu0 %834 }
 0x333   : > { %v902_v21 = vsel %vm850_vm1, %v835_v20, 0 }
 0x334   : > { %2178 = vmatpush3.bf16.xpose.msra.mxu1 %v902_v21 }
 0x335   : > { %2183 = vmatprep.subr.bf16.mxu1 %v2697_v4  ;;  %v837_v22 = vpop.permute.xlu1 %836 }
 0x336   : > { %v949_v23 = vsel %vm850_vm1, %v837_v22, 0  ;;  %v839_v24 = vpop.permute.xlu0 %838 }
 0x337   : > { %v996_v26 = vsel %vm850_vm1, %v839_v24, 0 }
 0x339   : > { %v830_v25 = vpop.permute.xlu1 %829 }
 0x33b   : > { %2180 = vmatmul.mubr.msk.bf16.vlgmr.msra.gmra.mrb[8].mxu1 %vm850_vm1, %v828_v19 }
 0x33c   : > { %2184 = vmatpush3.bf16.xpose.msra.mxu1 %v949_v23  ;;  %2185 = vmatprep.mubr.msk.bf16.mxu1 %vm2699_vm0, %v2697_v4 }
 0x33d   : > { %2189 = vmatprep.subr.bf16.mxu1 %v2697_v4  ;;  %v832_v27 = vpop.permute.xlu1 %831 }
 0x343   : > { %2186 = vmatmul.mubr.msk.bf16.vlgmr.msra.gmra.mrb[12].mxu1 %vm850_vm1, %v830_v25 }
 0x344   : > { %2190 = vmatpush3.bf16.xpose.msra.mxu1 %v996_v26  ;;  %2191 = vmatprep.mubr.msk.bf16.mxu1 %vm2699_vm0, %v2697_v4 }
 0x345   : > { %2201 = vmatprep.subr.bf16.mxu1 %v2697_v4 }
 0x34b   : > { %2192 = vmatmul.mubr.msk.bf16.vlgmr.msra.gmra.mrb[16].mxu1 %vm850_vm1, %v832_v27 }
 0x34c   : > { %2203 = vmatprep.mubr.msk.bf16.mxu1 %vm2699_vm0, %v2697_v4 }
 0x39b   : > { %v891_v29 = vpop.f32.mrb[4].mxu1 }
 0x39c   : > { %v1044_v31 = vsel %vm1041_vm2, %v891_v29, -1e+30  ;;  %v2175_v32 = vpop.f32.mrb[5].mxu1 }
 0x39d   : > { %v894_v33 = vpop.f32.mrb[6].mxu1  ;;  %v1053_v34 = vsel %vm1052_vm3, %v1044_v31, -inf }
 0x39e   : > { %v1045_v35 = vsel %vm1041_vm2, %v894_v33, -1e+30  ;;  %1054 = vmax.xlane.f32.xlu0 %v1053_v34  ;;  %v2176_v36 = vpop.f32.mrb[7].mxu1 }
 0x39f   : > { %v1056_v37 = vsel %vm1052_vm3, %v1045_v35, -inf }
 0x3a0   : > { %1057 = vmax.xlane.f32.xlu1 %v1056_v37 }
 0x40e   : > { %v938_v38 = vpop.f32.mrb[8].mxu1 }
 0x40f   : > { %v1046_v39 = vsel %vm1041_vm2, %v938_v38, -1e+30  ;;  %v2181_v40 = vpop.f32.mrb[9].mxu1 }
 0x410   : > { %v941_v41 = vpop.f32.mrb[10].mxu1  ;;  %v1059_v42 = vsel %vm1052_vm3, %v1046_v39, -inf }
 0x411   : > { %v1047_v43 = vsel %vm1041_vm2, %v941_v41, -1e+30  ;;  %1060 = vmax.xlane.f32.xlu0 %v1059_v42  ;;  %v2182_v44 = vpop.f32.mrb[11].mxu1 }
 0x412   : > { %v1062_v45 = vsel %vm1052_vm3, %v1047_v43, -inf }
 0x415   : > { %1063 = vmax.xlane.f32.xlu0 %v1062_v45 }
 0x416   : > { %v985_v46 = vpop.f32.mrb[12].mxu1 }
 0x417   : > { %v1048_v47 = vsel %vm1041_vm2, %v985_v46, -1e+30  ;;  %v2187_v48 = vpop.f32.mrb[13].mxu1 }
 0x418   : > { %v988_v49 = vpop.f32.mrb[14].mxu1  ;;  %v1065_v50 = vsel %vm1052_vm3, %v1048_v47, -inf }
 0x419   : > { %v1049_v51 = vsel %vm1041_vm2, %v988_v49, -1e+30  ;;  %1066 = vmax.xlane.f32.xlu0 %v1065_v50  ;;  %v2188_v52 = vpop.f32.mrb[15].mxu1 }
 0x41a   : > { %v1068_v53 = vsel %vm1052_vm3, %v1049_v51, -inf }
 0x41b   : > { %1069 = vmax.xlane.f32.xlu1 %v1068_v53 }
 0x41e   : > { %v1032_v56 = vpop.f32.mrb[16].mxu1 }
 0x41f   : > { %v1050_v57 = vsel %vm1041_vm2, %v1032_v56, -1e+30  ;;  %v2193_v59 = vpop.f32.mrb[17].mxu1 }
 0x420   : > { %v1035_v60 = vpop.f32.mrb[18].mxu1  ;;  %v1071_v61 = vsel %vm1052_vm3, %v1050_v57, -inf }
 0x421   : > { %v3108_v62 = vsel %vm1041_vm2, %v1035_v60, -1e+30  ;;  %1072 = vmax.xlane.f32.xlu0 %v1071_v61  ;;  %v2194_v63 = vpop.f32.mrb[19].mxu1 }
 0x422   : > { %v1074_v2 = vsel %vm1052_vm3, %v3108_v62, -inf }
 0x423   : > { %1075 = vmax.xlane.f32.xlu1 %v1074_v2 }
 0x42b   : > { %v1055_v3 = vpop.xlane.xlu0 %1054 }
 0x42c   : > { %v1077_v5 = vsub.f32 %v1044_v31, %v1055_v3 }
 0x42d   : > { %v1058_v6 = vpop.xlane.xlu1 %1057 }
 0x42e   : > { %v1085_v7 = vmul.f32 1.442695, %v1077_v5  ;;  %v1078_v8 = vsub.f32 %v1045_v35, %v1058_v6 }
 0x430   : > { %2424 = vpow2.f32 %v1085_v7  ;;  %v1087_v9 = vmul.f32 1.442695, %v1078_v8 }
 0x432   : > { %2426 = vpow2.f32 %v1087_v9 }
 0x43a   : > { %v2425_v10 = vpop.eup %2424 }
 0x43b   : > { %v1101_v11 = vsel %vm1052_vm3, %v2425_v10, 0.0 }
 0x43c   : > { %v2427_v12 = vpop.eup %2426  ;;  %1102 = vadd.xlane.f32.xlu0 %v1101_v11 }
 0x43d   : > { %v1104_v13 = vsel %vm1052_vm3, %v2427_v12, 0.0 }
 0x43e   : > { %1105 = vadd.xlane.f32.xlu1 %v1104_v13 }
 0x49e   : > { %v1061_v14 = vpop.xlane.xlu0 %1060 }
 0x49f   : > { %v1079_v15 = vsub.f32 %v1046_v39, %v1061_v14 }
 0x4a1   : > { %v1089_v17 = vmul.f32 1.442695, %v1079_v15 }
 0x4a2   : > { %v1064_v18 = vpop.xlane.xlu0 %1063 }
 0x4a3   : > { %2428 = vpow2.f32 %v1089_v17  ;;  %v1080_v19 = vsub.f32 %v1047_v43, %v1064_v18 }
 0x4a5   : > { %v1091_v20 = vmul.f32 1.442695, %v1080_v19 }
 0x4a6   : > { %v1067_v21 = vpop.xlane.xlu0 %1066 }
 0x4a7   : > { %2430 = vpow2.f32 %v1091_v20  ;;  %v1081_v22 = vsub.f32 %v1048_v47, %v1067_v21 }
 0x4a8   : > { %v1070_v23 = vpop.xlane.xlu1 %1069 }
 0x4a9   : > { %v1093_v24 = vmul.f32 1.442695, %v1081_v22  ;;  %v1082_v25 = vsub.f32 %v1049_v51, %v1070_v23 }
 0x4ab   : > { %2432 = vpow2.f32 %v1093_v24  ;;  %v1095_v26 = vmul.f32 1.442695, %v1082_v25  ;;  %v2372_v24 = vld [vmem:[#allocation7] sm:$0xff]   ;;  %v2373_v25 = vld [vmem:[#allocation7 + $0x8] sm:$0xff]  }
 0x4ad   : > { %v2429_v27 = vpop.eup %2428  ;;  %2434 = vpow2.f32 %v1095_v26 }
 0x4ae   : > { %v1073_v28 = vpop.xlane.xlu0 %1072  ;;  %v1107_v29 = vsel %vm1052_vm3, %v2429_v27, 0.0 }
 0x4af   : > { %v1083_v31 = vsub.f32 %v1050_v57, %v1073_v28  ;;  %1108 = vadd.xlane.f32.xlu0 %v1107_v29 }
 0x4b0   : > { %v1076_v41 = vpop.xlane.xlu1 %1075 }
 0x4b1   : > { %v2431_v32 = vpop.eup %2430  ;;  %v1097_v33 = vmul.f32 1.442695, %v1083_v31  ;;  %v1084_v48 = vsub.f32 %v3108_v62, %v1076_v41  ;;  %v2379_v41 = vld [vmem:[#allocation7 + $0x38] sm:$0xff]  }
 0x4b2   : > { %v1110_v34 = vsel %vm1052_vm3, %v2431_v32, 0.0 }
 0x4b3   : > { %2436 = vpow2.f32 %v1097_v33  ;;  %1111 = vadd.xlane.f32.xlu1 %v1110_v34  ;;  %v1099_v50 = vmul.f32 1.442695, %v1084_v48 }
 0x4b5   : > { %v2433_v35 = vpop.eup %2432 }
 0x4b6   : > { %v1113_v36 = vsel %vm1052_vm3, %v2433_v35, 0.0 }
 0x4b7   : > { %v2435_v37 = vpop.eup %2434  ;;  %1114 = vadd.xlane.f32.xlu0 %v1113_v36 }
 0x4b8   : > { %v1116_v38 = vsel %vm1052_vm3, %v2435_v37, 0.0 }
 0x4b9   : > { %1117 = vadd.xlane.f32.xlu1 %v1116_v38  ;;  %v2376_v38 = vld [vmem:[#allocation7 + $0x20] sm:$0xff]  }
 0x4bd   : > { %v2437_v39 = vpop.eup %2436 }
 0x4be   : > { %v1119_v40 = vsel %vm1052_vm3, %v2437_v39, 0.0 }
 0x4bf   : > { %1120 = vadd.xlane.f32.xlu0 %v1119_v40  ;;  %v2378_v40 = vld [vmem:[#allocation7 + $0x30] sm:$0xff]  }
 0x4c9   : > { %v1103_v42 = vpop.xlane.xlu0 %1102 }
 0x4ca   : > { %2438 = vrcp.f32 %v1103_v42  ;;  %844 = vrot.lane.b32.xlu1 %v3062_v16, %s2701_s18 }
 0x4cb   : > { %v1106_v43 = vpop.xlane.xlu1 %1105 }
 0x4cc   : > { %2440 = vrcp.f32 %v1106_v43 }
 0x4cd   : > { %2442 = vpow2.f32 %v1099_v50 }
 0x4d4   : > { %v2439_v44 = vpop.eup %2438 }
 0x4d5   : > { %841 = vrot.lane.b32.xlu0 %v3062_v16, %s2700_s30  ;;  %v1133_v46 = vmul.f32 %v2439_v44, %v2425_v10 }
 0x4d6   : > { %v2441_v45 = vpop.eup %2440 }
 0x4d7   : > { %v1134_v47 = vmul.f32 %v2441_v45, %v2427_v12  ;;  %v2443_v51 = vpop.eup %2442 }
 0x4d8   : > { %v1122_v52 = vsel %vm1052_vm3, %v2443_v51, 0.0 }
 0x4d9   : > { %v1141_v49 = vpack.c.bf16 %v1134_v47, %v1133_v46 }
 0x4db   : > { %2198 = vmatmul.mubr.msk.bf16.vlgmr.msra.gmra.mrb[4].mxu0 %vm1052_vm3, %v1141_v49 }
 0x4dc   : > { %2209 = vmatprep.mubr.msk.bf16.mxu0 %vm2699_vm0, %v2697_v4 }
 0x4ee   : > { %1123 = vadd.xlane.f32.xlu1 %v1122_v52 }
 0x4ff   : > { %847 = vrot.lane.b32.xlu1 %v3062_v16, %s2702_s10 }
 0x53c   : > { %v1109_v53 = vpop.xlane.xlu0 %1108 }
 0x540   : > { %v1112_v56 = vpop.xlane.xlu1 %1111 }
 0x541   : > { %2444 = vrcp.f32 %v1112_v56 }
 0x542   : > { %2446 = vrcp.f32 %v1109_v53 }
 0x544   : > { %v1115_v57 = vpop.xlane.xlu0 %1114 }
 0x545   : > { %2448 = vrcp.f32 %v1115_v57 }
 0x546   : > { %v1118_v59 = vpop.xlane.xlu1 %1117 }
 0x547   : > { %2450 = vrcp.f32 %v1118_v59 }
 0x54a   : > { %v845_v60 = vpop.permute.xlu1 %844 }
 0x54b   : > { %v2445_v61 = vpop.eup %2444  ;;  %2208 = vmatpush3.bf16.msra.mxu0 %v845_v60 }
 0x54c   : > { %v1121_v62 = vpop.xlane.xlu0 %1120  ;;  %2219 = vmatprep.subr.bf16.mxu0 %v2697_v4  ;;  %v2447_v63 = vpop.eup %2446  ;;  %v1136_v2 = vmul.f32 %v2445_v61, %v2431_v32 }
 0x54d   : > { %v1135_v5 = vmul.f32 %v2447_v63, %v2429_v27  ;;  %2452 = vrcp.f32 %v1121_v62  ;;  %v2374_v27 = vld [vmem:[#allocation7 + $0x10] sm:$0xff]  }
 0x54f   : > { %v2449_v3 = vpop.eup %2448  ;;  %v1142_v9 = vpack.c.bf16 %v1136_v2, %v1135_v5  ;;  %v2380_v2 = vld [vmem:[#allocation8] ss:$8 sps:$4 sm:$0xff]   ;;  %v2385_v5 = vld [vmem:[#allocation8 + $0x14] ss:$8 sps:$4 sm:$0xff]  }
 0x550   : > { %v842_v6 = vpop.permute.xlu0 %841  ;;  %v1137_v7 = vmul.f32 %v2449_v3, %v2433_v35  ;;  %v2375_v35 = vld [vmem:[#allocation7 + $0x18] sm:$0xff]   ;;  %v2382_v3 = vld [vmem:[#allocation8 + $0x4] ss:$8 sps:$4 sm:$0xff]  }
 0x551   : > { %v2451_v16 = vpop.eup %2450  ;;  %2202 = vmatpush3.bf16.msra.mxu1 %v842_v6  ;;  %v2383_v6 = vld [vmem:[#allocation8 + $0x10] ss:$8 sps:$4 sm:$0xff]  }
 0x552   : > { %v1138_v8 = vmul.f32 %v2451_v16, %v2435_v37  ;;  %2213 = vmatprep.subr.bf16.mxu1 %v2697_v4 }
 0x554   : > { %2204 = vmatmul.mubr.msk.bf16.vlgmr.msra.gmra.mrb[20].mxu1 %vm1052_vm3, %v1142_v9  ;;  %v1143_v10 = vpack.c.bf16 %v1138_v8, %v1137_v7 }
 0x555   : > { %2215 = vmatprep.mubr.msk.bf16.mxu1 %vm2699_vm0, %v2697_v4 }
 0x556   : > { %2210 = vmatmul.mubr.msk.bf16.vlgmr.msra.gmra.mrb[8].mxu0 %vm1052_vm3, %v1143_v10 }
 0x557   : > { %2235 = vmatprep.mubr.msk.bf16.mxu0 %vm2699_vm0, %v2697_v4  ;;  %v2453_v13 = vpop.eup %2452  ;;  %2220 = vmatpush3.bf16.msra.mxu0 %v2372_v24  ;;  %v2401_v24 = vld [vmem:[#allocation8 + $0x70] ss:$8 sps:$4 sm:$0xff]  }
 0x558   : > { %v1139_v15 = vmul.f32 %v2453_v13, %v2437_v39  ;;  %2221 = vmatprep.subr.bf16.mxu0 %v2697_v4  ;;  %v2377_v39 = vld [vmem:[#allocation7 + $0x28] sm:$0xff]  }
 0x559   : > { %v2386_v13 = vld [vmem:[#allocation8 + $0x20] ss:$8 sps:$4 sm:$0xff]  }
 0x55b   : > { %2222 = vmatpush3.bf16.msra.mxu0 %v2373_v25 }
 0x55c   : > { %2223 = vmatprep.subr.bf16.mxu0 %v2697_v4 }
 0x55f   : > { %2224 = vmatpush3.bf16.msra.mxu0 %v2374_v27 }
 0x560   : > { %2225 = vmatprep.subr.bf16.mxu0 %v2697_v4 }
 0x563   : > { %2226 = vmatpush3.bf16.msra.mxu0 %v2375_v35 }
 0x564   : > { %2227 = vmatprep.subr.bf16.mxu0 %v2697_v4 }
 0x567   : > { %2228 = vmatpush3.bf16.msra.mxu0 %v2376_v38 }
 0x568   : > { %2229 = vmatprep.subr.bf16.mxu0 %v2697_v4 }
 0x56b   : > { %2230 = vmatpush3.bf16.msra.mxu0 %v2377_v39 }
 0x56c   : > { %2231 = vmatprep.subr.bf16.mxu0 %v2697_v4 }
 0x56f   : > { %2232 = vmatpush3.bf16.msra.mxu0 %v2378_v40 }
 0x570   : > { %2233 = vmatprep.subr.bf16.mxu0 %v2697_v4  ;;  %v2044_v4 = vld [vmem:[%s3240_s6] ss:$0 sm:$0xff] }
 0x573   : > { %2234 = vmatpush3.bf16.msra.mxu0 %v2379_v41 }
 0x57b   : > { %v1124_v11 = vpop.xlane.xlu1 %1123 }
 0x57c   : > { %2454 = vrcp.f32 %v1124_v11 }
 0x57f   : > { %v848_v12 = vpop.permute.xlu1 %847 }
 0x580   : > { %2214 = vmatpush3.bf16.msra.mxu1 %v848_v12  ;;  %v2388_v12 = vld [vmem:[#allocation8 + $0x24] ss:$8 sps:$4 sm:$0xff]  }
 0x581   : > { %1607 = vmatprep.subr.bf16.mxu1 %v2382_v3 }
 0x586   : > { %v2455_v14 = vpop.eup %2454 }
 0x587   : > { %v1140_v17 = vmul.f32 %v2455_v14, %v2443_v51  ;;  %v2391_v14 = vld [vmem:[#allocation8 + $0x34] ss:$8 sps:$4 sm:$0xff]  }
 0x589   : > { %v1144_v18 = vpack.c.bf16 %v1140_v17, %v1139_v15  ;;  %v2389_v15 = vld [vmem:[#allocation8 + $0x30] ss:$8 sps:$4 sm:$0xff]   ;;  %v2394_v17 = vld [vmem:[#allocation8 + $0x44] ss:$8 sps:$4 sm:$0xff]  }
 0x58b   : > { %2216 = vmatmul.mubr.msk.bf16.vlgmr.msra.gmra.mrb[24].mxu1 %vm1052_vm3, %v1144_v18  ;;  %v2392_v18 = vld [vmem:[#allocation8 + $0x40] ss:$8 sps:$4 sm:$0xff]  }
 0x58c   : > { %1639 = vmatprep.mubr.bf16.mxu1 %v2698_v30  ;;  %1608 = vmatpush1.bf16.msra.mxu1 %v2380_v2 }
 0x58d   : > { %1609 = vmatprep.subr.bf16.mxu1 %v2385_v5 }
 0x590   : > { %1610 = vmatpush1.bf16.msra.mxu1 %v2383_v6 }
 0x591   : > { %1611 = vmatprep.subr.bf16.mxu1 %v2388_v12 }
 0x594   : > { %1612 = vmatpush1.bf16.msra.mxu1 %v2386_v13 }
 0x595   : > { %1613 = vmatprep.subr.bf16.mxu1 %v2391_v14 }
 0x598   : > { %1614 = vmatpush1.bf16.msra.mxu1 %v2389_v15 }
 0x599   : > { %1615 = vmatprep.subr.bf16.mxu1 %v2394_v17 }
 0x59c   : > { %1616 = vmatpush1.bf16.msra.mxu1 %v2392_v18 }
 0x5ae   : > { %v1182_v19 = vpop.f32.mrb[4].mxu0 }
 0x5af   : > { %v2199_v20 = vpop.f32.mrb[5].mxu0 }
 0x5b0   : > { %v1185_v21 = vpop.f32.mrb[6].mxu0  ;;  %v2395_v20 = vld [vmem:[#allocation8 + $0x50] ss:$8 sps:$4 sm:$0xff]  }
 0x5b1   : > { %v1321_v22 = vpack.c.bf16 %v1185_v21, %v1182_v19  ;;  %v2200_v23 = vpop.f32.mrb[7].mxu0  ;;  %v2397_v19 = vld [vmem:[#allocation8 + $0x54] ss:$8 sps:$4 sm:$0xff]   ;;  %v2400_v21 = vld [vmem:[#allocation8 + $0x64] ss:$8 sps:$4 sm:$0xff]  }
 0x5b2   : > { %1617 = vmatprep.subr.bf16.mxu1 %v2397_v19  ;;  %v2403_v23 = vld [vmem:[#allocation8 + $0x74] ss:$8 sps:$4 sm:$0xff]  }
 0x5b3   : > { %1618 = vmatpush1.bf16.msra.mxu1 %v2395_v20 }
 0x5b4   : > { %1619 = vmatprep.subr.bf16.mxu1 %v2400_v21 }
 0x627   : > { %v1226_v26 = vpop.f32.mrb[20].mxu1 }
 0x628   : > { %v2205_v28 = vpop.f32.mrb[21].mxu1 }
 0x629   : > { %v1229_v29 = vpop.f32.mrb[22].mxu1  ;;  %v1270_v31 = vpop.f32.mrb[8].mxu0 }
 0x62a   : > { %v1322_v32 = vpack.c.bf16 %v1229_v29, %v1226_v26  ;;  %v2206_v30 = vpop.f32.mrb[23].mxu1  ;;  %v2211_v33 = vpop.f32.mrb[9].mxu0 }
 0x62b   : > { %v1273_v34 = vpop.f32.mrb[10].mxu0  ;;  %v2053_v33 = vld [vmem:[%s3241_s7] ss:$0 sm:$0xff] }
 0x62c   : > { %v1323_v36 = vpack.c.bf16 %v1273_v34, %v1270_v31  ;;  %v2212_v37 = vpop.f32.mrb[11].mxu0  ;;  %1326 = vrot.lane.b32.xlu1 %v1322_v32, %s2702_s10  ;;  %s3282_s10 = sld [smem:[#allocation21_spill]] }
 0x62d   : > { %v2054_v37 = vld [vmem:[%s3280_s22] ss:$0 sm:$0xff]  ;;  %s3189_s22 = scalar_lea.hbm %s3283_s16, %s2094_s13 }
 0x62e   : > { %1329 = vrot.lane.b32.xlu0 %v1323_v36, %s2701_s18 }
 0x65e   : > { %v1314_v42 = vpop.f32.mrb[24].mxu1 }
 0x65f   : > { %v2217_v43 = vpop.f32.mrb[25].mxu1 }
 0x660   : > { %v1317_v44 = vpop.f32.mrb[26].mxu1  ;;  %v2405_v43 = vld [vmem:[#allocation10] sm:$0xff]  }
 0x661   : > { %v1324_v45 = vpack.c.bf16 %v1317_v44, %v1314_v42  ;;  %v2218_v46 = vpop.f32.mrb[27].mxu1  ;;  %v2404_v42 = vld [vmem:[#allocation10 + $0x40] sm:$0xff]   ;;  %v2406_v44 = vld [vmem:[#allocation10 + $0x48] sm:$0xff]  }
 0x662   : > { %2129 = vmatprep.subr.bf16.mxu0 %v2404_v42  ;;  %v2408_v46 = vld [vmem:[#allocation10 + $0x50] sm:$0xff]  }
 0x663   : > { %1332 = vrot.lane.b32.xlu1 %v1324_v45, %s2700_s30  ;;  %v2407_v45 = vld [vmem:[#allocation10 + $0x8] sm:$0xff]  }
 0x69e   : > { %v1327_v47 = vpop.permute.xlu1 %1326 }
 0x69f   : > { %v1336_v48 = vsel %vm850_vm1, %v1321_v22, %v1327_v47  ;;  %v2398_v22 = vld [vmem:[#allocation8 + $0x60] ss:$8 sps:$4 sm:$0xff]   ;;  %v2409_v47 = vld [vmem:[#allocation10 + $0x10] sm:$0xff]  }
 0x6a0   : > { %v1330_v49 = vpop.permute.xlu0 %1329  ;;  %1620 = vmatpush1.bf16.msra.mxu1 %v2398_v22 }
 0x6a1   : > { %v1339_v50 = vsel %vm1337_vm4, %v1336_v48, %v1330_v49  ;;  %1621 = vmatprep.subr.bf16.mxu1 %v2403_v23  ;;  %v2410_v48 = vld [vmem:[#allocation10 + $0x58] sm:$0xff]  }
 0x6a2   : > { %v2411_v49 = vld [vmem:[#allocation10 + $0x18] sm:$0xff]  }
 0x6a4   : > { %1622 = vmatpush1.bf16.msra.mxu1 %v2401_v24 }
 0x6d5   : > { %v1333_v51 = vpop.permute.xlu1 %1332 }
 0x6d6   : > { %v1342_v52 = vsel %vm1340_vm5, %v1339_v50, %v1333_v51  ;;  %v2412_v50 = vld [vmem:[#allocation10 + $0x60] sm:$0xff]  }
 0x6d7   : > { %2236 = vmatmul.mubr.bf16.vlgmr.msra.gmra.mrb[12].mxu0 %v1342_v52  ;;  %v2413_v51 = vld [vmem:[#allocation10 + $0x20] sm:$0xff]   ;;  %v2414_v52 = vld [vmem:[#allocation10 + $0x68] sm:$0xff]  }
 0x6d8   : > { %2130 = vmatpush3.bf16.msra.mxu0 %v2405_v43 }
 0x6d9   : > { %2131 = vmatprep.subr.bf16.mxu0 %v2406_v44 }
 0x6dc   : > { %2132 = vmatpush3.bf16.msra.mxu0 %v2407_v45 }
 0x6dd   : > { %2133 = vmatprep.subr.bf16.mxu0 %v2408_v46  ;;  %v2071_v46 = vld [vmem:[%s3282_s10] ss:$0 sm:$0xff] }
 0x6e0   : > { %2134 = vmatpush3.bf16.msra.mxu0 %v2409_v47 }
 0x6e1   : > { %2135 = vmatprep.subr.bf16.mxu0 %v2410_v48 }
 0x6e4   : > { %2136 = vmatpush3.bf16.msra.mxu0 %v2411_v49 }
 0x6e5   : > { %2137 = vmatprep.subr.bf16.mxu0 %v2412_v50 }
 0x6e8   : > { %2138 = vmatpush3.bf16.msra.mxu0 %v2413_v51 }
 0x6e9   : > { %2139 = vmatprep.subr.bf16.mxu0 %v2414_v52 }
 0x7aa   : > { %v1449_v53 = vpop.f32.mrb[12].mxu0 }
 0x7ab   : > { %v1450_v56 = vadd.f32 %v2044_v4, %v1449_v53  ;;  %v2237_v57 = vpop.f32.mrb[13].mxu0  ;;  %v2416_v53 = vld [vmem:[#allocation10 + $0x70] sm:$0xff]  }
 0x7ac   : > { %v1452_v59 = vpop.f32.mrb[14].mxu0  ;;  %v2418_v57 = vld [vmem:[#allocation10 + $0x78] sm:$0xff]  }
 0x7ad   : > { %v3155_v60 = vadd.f32 %v1450_v56, %v3008_v0  ;;  %v1453_v61 = vadd.f32 %v2044_v4, %v1452_v59  ;;  %v2238_v62 = vpop.f32.mrb[15].mxu0  ;;  %v2415_v4 = vld [vmem:[#allocation10 + $0x28] sm:$0xff]   ;;  %v2417_v56 = vld [vmem:[#allocation10 + $0x30] sm:$0xff]   ;;  %v2419_v59 = vld [vmem:[#allocation10 + $0x38] sm:$0xff]  }
 0x7ae   : > { %2140 = vmatpush3.bf16.msra.mxu0 %v2415_v4 }
 0x7af   : > { %v3158_v63 = vadd.f32 %v1453_v61, %v3010_v1  ;;  %1460 = vadd.xlane.f32.xlu0 %v3155_v60  ;;  %2141 = vmatprep.subr.bf16.mxu0 %v2416_v53  ;;  %v1515_v61 = vld [vmem:[%s3281_s17] sm:$0x3]  ;;  %s2616_s17 = scalar_lea.vmem %s2615_s3, 512 }
 0x7b0   : > { %v1520_v62 = vrot.slane %v1515_v61, %v598_v55  ;;  %v1524_v2 = vrot.slane %v1515_v61, %v602_v58  ;;  %p2618_p2 = scmp.lt.s32.totalorder %s2616_s17, %s2610_s21 }
 0x7b1   : > { %1462 = vadd.xlane.f32.xlu1 %v3158_v63 }
 0x7b2   : > { %2142 = vmatpush3.bf16.msra.mxu0 %v2417_v56  ;;  %p2619_p1 = por %p2618_p2, %p2617_p12 }
 0x7b3   : > { %2143 = vmatprep.subr.bf16.mxu0 %v2418_v57 }
 0x7b4   : > { %p2620_p13 = pnand %p2619_p1, %p2613_p7 }
 0x7b6   : > { %2144 = vmatpush3.bf16.msra.mxu0 %v2419_v59 }
 0x83c   : > { %v1461_v16 = vpop.xlane.xlu0 %1460 }
 0x83d   : > { %v1464_v0 = vmul.f32 0.0078125, %v1461_v16 }
 0x83e   : > { %v1463_v7 = vpop.xlane.xlu1 %1462 }
 0x83f   : > { %v1466_v8 = vsub.f32 %v3155_v60, %v1464_v0  ;;  %v1465_v9 = vmul.f32 0.0078125, %v1463_v7 }
 0x841   : > { %v1467_v1 = vsub.f32 %v3158_v63, %v1465_v9  ;;  %v1468_v10 = vmul.f32 %v1466_v8, %v1466_v8 }
 0x843   : > { %1470 = vadd.xlane.f32.xlu0 %v1468_v10  ;;  %v1469_v11 = vmul.f32 %v1467_v1, %v1467_v1 }
 0x847   : > { %1472 = vadd.xlane.f32.xlu0 %v1469_v11 }
 0x8d0   : > { %v1471_v25 = vpop.xlane.xlu0 %1470 }
 0x8d1   : > { %v1474_v26 = vmul.f32 0.0078125, %v1471_v25 }
 0x8d3   : > { %v1476_v27 = vadd.f32 1e-05, %v1474_v26 }
 0x8d4   : > { %v1473_v28 = vpop.xlane.xlu0 %1472 }
 0x8d5   : > { %2456 = vrsqrt.f32 %v1476_v27  ;;  %v1475_v29 = vmul.f32 0.0078125, %v1473_v28 }
 0x8d7   : > { %v1477_v31 = vadd.f32 1e-05, %v1475_v29 }
 0x8d9   : > { %2458 = vrsqrt.f32 %v1477_v31 }
 0x8df   : > { %v2457_v32 = vpop.eup %2456 }
 0x8e0   : > { %v1480_v30 = vmul.f32 %v2457_v32, %v1466_v8 }
 0x8e2   : > { %v1488_v36 = vmul.f32 %v2053_v33, %v1480_v30 }
 0x8e3   : > { %v2459_v34 = vpop.eup %2458 }
 0x8e4   : > { %v1481_v35 = vmul.f32 %v2459_v34, %v1467_v1  ;;  %v1496_v39 = vadd.f32 %v2054_v37, %v1488_v36 }
 0x8e6   : > { %v1489_v38 = vmul.f32 %v2053_v33, %v1481_v35 }
 0x8e8   : > { %v1497_v40 = vadd.f32 %v2054_v37, %v1489_v38 }
 0x8ea   : > { %v1498_v41 = vpack.c.bf16 %v1497_v40, %v1496_v39 }
 0x8ec   : > { %1640 = vmatmul.mubr.bf16.vlgmr.msra.gmra.mrb[28].mxu1 %v1498_v41 }
 0x9bf   : > { %v1641_v3 = vpop.f32.mrb[28].mxu1 }
 0x9c0   : > { %v1642_v5 = vadd.f32 %v1641_v3, %v1520_v62  ;;  %v1643_v6 = vpop.f32.mrb[29].mxu1 }
 0x9c1   : > { %v1644_v16 = vadd.f32 %v1643_v6, %v1524_v2  ;;  %v1645_v0 = vpop.f32.mrb[30].mxu1 }
 0x9c2   : > { %v1654_v7 = vmul.f32 0.044715, %v1642_v5  ;;  %v1646_v8 = vadd.f32 %v1645_v0, %v1520_v62  ;;  %v1647_v9 = vpop.f32.mrb[31].mxu1  ;;  %v1650_v33 = vmul.f32 0.5, %v1642_v5 }
 0x9c3   : > { %v1655_v1 = vmul.f32 0.044715, %v1644_v16  ;;  %v1648_v10 = vadd.f32 %v1647_v9, %v1524_v2  ;;  %v1651_v36 = vmul.f32 0.5, %v1644_v16 }
 0x9c4   : > { %v1658_v11 = vmul.f32 %v1654_v7, %v1642_v5  ;;  %v1656_v12 = vmul.f32 0.044715, %v1646_v8  ;;  %v1652_v34 = vmul.f32 0.5, %v1646_v8 }
 0x9c5   : > { %v1659_v13 = vmul.f32 %v1655_v1, %v1644_v16  ;;  %v1657_v14 = vmul.f32 0.044715, %v1648_v10  ;;  %v1653_v37 = vmul.f32 0.5, %v1648_v10 }
 0x9c6   : > { %v1662_v15 = vmul.f32 %v1658_v11, %v1642_v5  ;;  %v1660_v17 = vmul.f32 %v1656_v12, %v1646_v8 }
 0x9c7   : > { %v1663_v55 = vmul.f32 %v1659_v13, %v1644_v16  ;;  %v1661_v18 = vmul.f32 %v1657_v14, %v1648_v10 }
 0x9c8   : > { %v1666_v54 = vadd.f32 %v1662_v15, %v1642_v5  ;;  %v1664_v58 = vmul.f32 %v1660_v17, %v1646_v8 }
 0x9c9   : > { %v1665_v19 = vmul.f32 %v1661_v18, %v1648_v10  ;;  %v1667_v20 = vadd.f32 %v1663_v55, %v1644_v16 }
 0x9ca   : > { %v1670_v21 = vmul.f32 0.7978846, %v1666_v54  ;;  %v1668_v22 = vadd.f32 %v1664_v58, %v1646_v8 }
 0x9cb   : > { %v1669_v23 = vadd.f32 %v1665_v19, %v1648_v10  ;;  %v1671_v24 = vmul.f32 0.7978846, %v1667_v20 }
 0x9cc   : > { %2460 = vtanh.f32 %v1670_v21  ;;  %v1672_v25 = vmul.f32 0.7978846, %v1668_v22 }
 0x9cd   : > { %v1673_v26 = vmul.f32 0.7978846, %v1669_v23  ;;  %2462 = vtanh.f32 %v1671_v24 }
 0x9ce   : > { %2464 = vtanh.f32 %v1672_v25 }
 0x9cf   : > { %2466 = vtanh.f32 %v1673_v26 }
 0x9d6   : > { %v2461_v27 = vpop.eup %2460 }
 0x9d7   : > { %v2463_v28 = vpop.eup %2462  ;;  %v1678_v29 = vadd.f32 1.0, %v2461_v27 }
 0x9d8   : > { %v2465_v31 = vpop.eup %2464  ;;  %v1679_v32 = vadd.f32 1.0, %v2463_v28 }
 0x9d9   : > { %v2467_v30 = vpop.eup %2466  ;;  %v1680_v35 = vadd.f32 1.0, %v2465_v31  ;;  %v1682_v39 = vmul.f32 %v1678_v29, %v1650_v33 }
 0x9da   : > { %v1681_v38 = vadd.f32 1.0, %v2467_v30  ;;  %v1683_v41 = vmul.f32 %v1679_v32, %v1651_v36 }
 0x9db   : > { %v1684_v40 = vmul.f32 %v1680_v35, %v1652_v34 }
 0x9dc   : > { %v1685_v42 = vmul.f32 %v1681_v38, %v1653_v37 }
 0x9dd   : > { %v1686_v43 = vpack.c.bf16 %v1684_v40, %v1682_v39 }
 0x9de   : > { %v1687_v44 = vpack.c.bf16 %v1685_v42, %v1683_v41 }
 0x9e0   : > { %1855 = vmatprep.mubr.bf16.mxu0 %v1687_v44 }
 0x9e1   : > { %1856 = vmatmul.mubr.bf16.vlgmr.msra.gmra.mrb[16].mxu0 %v1686_v43 }
 0xab4   : > { %v2145_v45 = vpop.f32.mrb[16].mxu0 }
 0xab5   : > { %v2146_v47 = vpop.f32.mrb[17].mxu0 }
 0xab6   : > { %v2147_v48 = vadd.f32 %v2146_v47, %v2145_v45  ;;  %v2148_v49 = vpop.f32.mrb[18].mxu0 }
 0xab7   : > { %v2149_v50 = vpop.f32.mrb[19].mxu0 }
 0xab8   : > { %v1858_v51 = vadd.f32 %v2147_v48, %v2071_v46  ;;  %v2150_v52 = vadd.f32 %v2149_v50, %v2148_v49 }
 0xaba   : > { %v1864_v4 = vadd.f32 %v1858_v51, %v3155_v60  ;;  %v1861_v53 = vadd.f32 %v2150_v52, %v2071_v46 }
 0xabc   : > { %1866 = vst [vmem:[%s516_s23] sm:$0xff] %v1864_v4  ;;  %v1865_v56 = vadd.f32 %v1861_v53, %v3158_v63 }
 0xabe   : > { %1867 = vst [vmem:[%s516_s23 + $0x8] sm:$0xff] %v1865_v56 }
 0xabf   : > { %2623 = shalt.err (!%p2620_p13)
}
 0xac0   : > { %s2624_s30 = scalar_lea.hbm %s3189_s22, 256  ;;  %s2628_s23 = scalar_lea.hbm %s3283_s16, 512 }
 0xac1   : > { %p2625_p9 = scmp.ne.s32.totalorder %s3189_s22, %s2624_s30  ;;  %p2629_p4 = scmp.lt.u32.totalorder %s3189_s22, %s3283_s16 }
 0xac2   : > { %p2630_p8 = scmp.lt.u32.totalorder %s2628_s23, %s2624_s30  ;;  %p2632_p3 = scmp.lt.u32.totalorder %s2624_s30, %s3189_s22 }
 0xac3   : > { %p2626_p0 = pnand %p2625_p9, %p2935_p10 }
 0xac4   : > { %p2631_p6 = por %p2630_p8, %p2629_p4 }
 0xac5   : > { %p2627_p11 = pneg %p2626_p0 }
 0xac6   : > { %p2633_p5 = por %p2632_p3, %p2631_p6 }
 0xac8   : > { %p2634_p7 = pnand %p2633_p5, %p2627_p11 }
 0xaca   : > { %2637 = shalt.err (!%p2634_p7)
}
 0xacb   : > { %s2704_s14 = smov 128   ;;  %s2705_s21 = smov 8  }
 0xacc   : > { %2257 = dma.vmem_to_hbm [thread:$0]  (%p2935_p10), %s3184_s19, 256, %s3189_s22, %s1869_s12, %s2704_s14, %s2704_s14, %s2705_s21  }
 0xacd PF: > { %s3284_s29 = sld [smem:[#allocation16_spill]]  ;;  %s3285_s3 = sld [smem:[#allocation17_spill]] }
 0xace   : > { %p3287_p2 = scmp.ge.s32.totalorder %s2684_s28, 2 }
 0xad3   : > { %s1897_s17 = sand.u32 1, %s3284_s29   ;;  %p3286_p12 = scmp.ne.s32.totalorder %s3285_s3, 0 }
 0xad4   : > { %s1898_s30 = scalar_lea.sflag [#allocation4], %s1897_s17 }
 0xad5   : > { %p2277_p1 = pnand %p3287_p2, %p3286_p12 }
 0xad7   : > { %2667 = dma.done.wait (!%p2277_p1), %s1898_s30, 256  }
 0xad8   : > { %2669 = vsyncadd (!%p2277_p1), %s1898_s30, 4294967040  ;;  %p28_p13 = scmp.ge.s32.totalorder %s2925_s15, 4   ;;  %s3288_s25 = smov %s2676_s26 }
 0xad9   : > { %s3289_s26 = smov %s2680_s27  ;;  %s3290_s27 = smov %s2941_s24 }
 0xada   : > { %s3291_s28 = smov %s2925_s15  ;;  %30 = sbr.rel (!%p28_p13) target bundleno = 13 (0xd), region = 133 }
 0xae1   :  { %1903 = vsyncpa [#allocation3], 1 }
 0xae2   :  { %1905 = vsyncpa [#allocation3 + $0x1], 1 }
 0xae3   :  { %1906 = vsyncpa [#allocation6], 1 }
 0xae4   :  { %1907 = vsyncpa [#allocation9], 1 }
 0xae5   :  { %1908 = vsyncpa [#allocation4], 1 }
 0xae6   :  { %1910 = vsyncpa [#allocation4 + $0x1], 1 }

</bundles_post_ra>
